<compile_context>
chip_gen: v7x
topology: tpu7x:2x2x1
jax: 0.10.0
libtpu: 0.0.40
codegen_flags: <defaults>
</compile_context>

<pallas_src>
import math

import jax
import jax.numpy as jnp
from jax.experimental import pallas as pl
from jax.experimental.pallas import tpu as pltpu


# ----------------------- Config (mirrors src Config) -----------------------
class Config:
    bert_features = 32                 # hidden size of the tiny BERT encoder
    discriminator_hidden_layer = 64
    dropout = 0.1                      # forward implemented in eval mode -> identity


VOCAB = 64
MAX_POS = 16
TYPE_VOCAB = 2
NUM_LAYERS = 2
NUM_HEADS = 2
HEAD_DIM = Config.bert_features // NUM_HEADS
INTERMEDIATE = 64
LN_EPS = 1e-12
NEG_BIG = 1e9
MXU_DTYPE = jnp.bfloat16               # matmul operand dtype (f32 accumulation)
OUT_LANES = 128                        # lane-dense packed output width


# ----------------------------- kernel helpers ------------------------------
def _layernorm(x, g, b, eps=LN_EPS):
    mu = jnp.mean(x, axis=-1, keepdims=True)
    var = jnp.mean((x - mu) ** 2, axis=-1, keepdims=True)
    return (x - mu) * jax.lax.rsqrt(var + eps) * g + b


def _gelu(x):
    # TODO(synk): BERT uses exact erf-GELU; tanh approximation used here.
    c = math.sqrt(2.0 / math.pi)
    return 0.5 * x * (1.0 + jnp.tanh(c * (x + 0.044715 * x * x * x)))


def _softmax_last(x, approx):
    m = jnp.max(x, axis=-1, keepdims=True)
    p = jnp.exp(x - m)
    s = jnp.sum(p, axis=-1, keepdims=True)
    if approx:
        return p * pl.reciprocal(s, approx=True)   # EUP slot -> nearly free
    return p / s                                   # exact (final probabilities)


# ------------------------------ fused Pallas kernel ------------------------------
def ganbert_kernel(emb_ref, mask_ref, eln_ref,
                   wqkv_ref, wof_ref, wi_ref,
                   bqkv_ref, bi_ref, bmisc_ref,
                   adv_ref, dw1_ref, dw2_ref, db1_ref, db2_ref,
                   out_ref):
    B, _, S = mask_ref.shape
    H = eln_ref.shape[-1]
    D = HEAD_DIM
    NH = NUM_HEADS
    M = adv_ref.shape[0]
    C1 = db2_ref.shape[-1]
    scale = 1.0 / math.sqrt(D)

    # ---- BERT embedding LayerNorm into the activation carry (a plain value) ----
    x = _layernorm(emb_ref[...], eln_ref[0:1, :], eln_ref[1:2, :])        # (B*S, H) f32

    # Additive key mask, materialized ONCE, heads folded into the leading batch axis.
    mask3 = jnp.concatenate([mask_ref[...]] * NH, axis=0)                  # (NH*B, 1, S)
    mask_full = jnp.broadcast_to(mask3, (NH * B, S, S))                    # (NH*B, S, S)

    # ---- encoder layers: static unrolled loop, all weights already resident in VMEM ----
    for l in range(NUM_LAYERS):
        x_b = x.astype(MXU_DTYPE)
        # fused QKV matmul over all batch rows; single bf16 cast after the bias add
        qkv = jnp.dot(x_b, wqkv_ref[l],
                      preferred_element_type=jnp.float32) + bqkv_ref[l]    # (B*S, 3H) f32
        qkv_b = qkv.astype(MXU_DTYPE)                                      # (B*S, 3H) bf16

        # fold heads into the leading batch axis (major-axis concat: no lane relayout)
        q_all = jnp.concatenate(
            [qkv_b[:, h * D:(h + 1) * D].reshape(B, S, D) for h in range(NH)], axis=0)
        k_all = jnp.concatenate(
            [qkv_b[:, H + h * D:H + (h + 1) * D].reshape(B, S, D) for h in range(NH)], axis=0)
        v_all = jnp.concatenate(
            [qkv_b[:, 2 * H + h * D:2 * H + (h + 1) * D].reshape(B, S, D) for h in range(NH)],
            axis=0)                                                        # (NH*B, S, D) bf16

        # ONE head-batched score einsum + ONE context einsum per layer.
        # (The D-contraction orientation of k is an activation-side relayout; it cannot be
        #  folded into the QKV weight packing, and at D=16 / S=8 it is negligible.)
        s = jnp.einsum('bqd,bkd->bqk', q_all, k_all,
                       preferred_element_type=jnp.float32) * scale + mask_full
        p = _softmax_last(s, approx=True)
        ctx = jnp.einsum('bqk,bkd->bqd', p.astype(MXU_DTYPE), v_all,
                         preferred_element_type=jnp.float32)               # (NH*B, S, D) f32

        wof = wof_ref[l]                                                   # (H+I, H) bf16: [Wo; Wf]
        misc = bmisc_ref[l]                                                # (6, H) f32
        bo, bf_, ln1g, ln1b, ln2g, ln2b = (misc[i:i + 1, :] for i in range(6))

        # Output projection accumulated per head-block of Wo -> no lane-axis concat of heads.
        attn = bo
        for h in range(NH):
            ctx_h = ctx[h * B:(h + 1) * B].reshape(B * S, D).astype(MXU_DTYPE)
            attn = attn + jnp.dot(ctx_h, wof[h * D:(h + 1) * D, :],
                                  preferred_element_type=jnp.float32)
        h1 = _layernorm(attn + x, ln1g, ln1b)

        inter = _gelu(jnp.dot(h1.astype(MXU_DTYPE), wi_ref[l],
                              preferred_element_type=jnp.float32) + bi_ref[l])
        ffn = jnp.dot(inter.astype(MXU_DTYPE), wof[H:, :],
                      preferred_element_type=jnp.float32) + bf_
        x = _layernorm(ffn + h1, ln2g, ln2b)                               # (B*S, H) f32

    # ---- GanBert head: cat([CLS], adv) -> Discriminator -> softmax ----
    cls = x.reshape(B, S, H)[:, 0, :]                                      # (B, H), one strided read
    feats = jnp.concatenate([cls, adv_ref[...]], axis=0)                   # (B+M, H)
    hd = jnp.dot(feats.astype(MXU_DTYPE), dw1_ref[...],
                 preferred_element_type=jnp.float32) + db1_ref[...]
    hd = jnp.where(hd > 0, hd, 0.01 * hd)                                  # LeakyReLU default slope
    # TODO(synk): nn.Dropout implemented in eval mode (identity).
    logits = jnp.dot(hd.astype(MXU_DTYPE), dw2_ref[...],
                     preferred_element_type=jnp.float32) + db2_ref[...]
    probs = _softmax_last(logits, approx=False)

    # Lane-dense packed output: [feats | probs | zero pad] -> one unmasked 128-lane store.
    pad = jnp.zeros((B + M, OUT_LANES - H - C1), jnp.float32)
    out_ref[...] = jnp.concatenate([feats, probs, pad], axis=-1)


# ------------------------------- parameters ---------------------------------
def init_params(key, nclasses):
    H = Config.bert_features
    Dh = Config.discriminator_hidden_layer
    I = INTERMEDIATE
    C1 = nclasses + 1
    keys = jax.random.split(key, 6)

    def nrm(k, shape, scale=0.02):
        return (scale * jax.random.normal(k, shape)).astype(jnp.float32)

    # stacked per-layer weights (leading layer axis), packed into few slabs
    w_qkv, w_of, w_i = [], [], []
    lkeys = jax.random.split(keys[5], NUM_LAYERS)
    for i in range(NUM_LAYERS):
        sk = jax.random.split(lkeys[i], 4)
        w_qkv.append(nrm(sk[0], (H, 3 * H)))                          # [Wq | Wk | Wv]
        w_of.append(jnp.concatenate([nrm(sk[1], (H, H)),              # Wo
                                     nrm(sk[2], (I, H))], axis=0))    # Wf
        w_i.append(nrm(sk[3], (H, I)))
    zeros_h = jnp.zeros((H,), jnp.float32)
    ones_h = jnp.ones((H,), jnp.float32)
    b_misc_layer = jnp.stack([zeros_h, zeros_h, ones_h, zeros_h, ones_h, zeros_h])  # (6, H)

    return {
        "word_emb": nrm(keys[0], (VOCAB, H)),
        "pos_emb": nrm(keys[1], (MAX_POS, H)),
        "type_emb": nrm(keys[2], (TYPE_VOCAB, H)),
        "emb_ln": jnp.stack([ones_h, zeros_h]),                       # (2, H) [gamma; beta]
        "w_qkv": jnp.stack(w_qkv).astype(MXU_DTYPE),                  # (L, H, 3H)
        "w_of": jnp.stack(w_of).astype(MXU_DTYPE),                    # (L, H+I, H)
        "w_i": jnp.stack(w_i).astype(MXU_DTYPE),                      # (L, H, I)
        "b_qkv": jnp.zeros((NUM_LAYERS, 1, 3 * H), jnp.float32),
        "b_i": jnp.zeros((NUM_LAYERS, 1, I), jnp.float32),
        "b_misc": jnp.tile(b_misc_layer[None], (NUM_LAYERS, 1, 1)),   # (L, 6, H)
        "d_w1": nrm(keys[3], (H, Dh)).astype(MXU_DTYPE),
        "d_b1": jnp.zeros((1, Dh), jnp.float32),
        "d_w2": nrm(keys[4], (Dh, C1)).astype(MXU_DTYPE),
        "d_b2": jnp.zeros((1, C1), jnp.float32),
    }


# --------------------------------- forward ----------------------------------
@jax.jit
def gan_bert_forward(params, inputs, adv):
    input_ids = inputs["input_ids"]
    token_type_ids = inputs["token_type_ids"]
    attention_mask = inputs["attention_mask"].astype(jnp.float32)
    B, S = input_ids.shape
    H = Config.bert_features
    Dh = Config.discriminator_hidden_layer
    I = INTERMEDIATE
    M = adv.shape[0]
    C1 = params["d_b2"].shape[-1]
    L = NUM_LAYERS

    # BERT embeddings (gather = glue); LayerNorm + everything else happens in-kernel.
    pos_ids = jnp.arange(S)
    emb = (params["word_emb"][input_ids]
           + params["pos_emb"][pos_ids][None, :, :]
           + params["type_emb"][token_type_ids]).astype(jnp.float32)
    emb2 = emb.reshape(B * S, H)
    mask_bias = (attention_mask - 1.0)[:, None, :] * NEG_BIG              # (B, 1, S)

    c2 = lambda i: (0, 0)
    c3 = lambda i: (0, 0, 0)

    grid_spec = pltpu.PrefetchScalarGridSpec(
        num_scalar_prefetch=0,
        grid=(1,),                                    # single step: all ~32 KB of weights resident
        in_specs=[
            pl.BlockSpec((B * S, H), c2),             # embeddings (post-gather)
            pl.BlockSpec((B, 1, S), c3),              # additive key mask
            pl.BlockSpec((2, H), c2),                 # embedding LN [gamma; beta]
            pl.BlockSpec((L, H, 3 * H), c3),          # stacked fused QKV weights
            pl.BlockSpec((L, H + I, H), c3),          # stacked [Wo; Wf] slabs
            pl.BlockSpec((L, H, I), c3),              # stacked Wi
            pl.BlockSpec((L, 1, 3 * H), c3),          # stacked QKV bias
            pl.BlockSpec((L, 1, I), c3),              # stacked Wi bias
            pl.BlockSpec((L, 6, H), c3),              # stacked bo, bf, ln1g, ln1b, ln2g, ln2b
            pl.BlockSpec((M, H), c2),                 # adv features
            pl.BlockSpec((H, Dh), c2),                # discriminator W1
            pl.BlockSpec((Dh, C1), c2),               # discriminator W2
            pl.BlockSpec((1, Dh), c2),                # discriminator b1
            pl.BlockSpec((1, C1), c2),                # discriminator b2
        ],
        out_specs=pl.BlockSpec((B + M, OUT_LANES), c2),   # lane-dense packed output slab
    )

    # TODO(synk): at BERT-base scale add a "parallel" row-tile grid axis (v7x has 2 TCs) and set
    # pltpu.CompilerParams(vmem_limit_bytes=...) explicitly (v7x 64 MiB physical, v5e 16 MiB
    # default scoped limit); irrelevant at this toy size.
    slab = pl.pallas_call(
        ganbert_kernel,
        out_shape=jax.ShapeDtypeStruct((B + M, OUT_LANES), jnp.float32),
        grid_spec=grid_spec,
        compiler_params=pltpu.CompilerParams(
            dimension_semantics=("arbitrary",)),
    )(emb2, mask_bias, params["emb_ln"],
      params["w_qkv"], params["w_of"], params["w_i"],
      params["b_qkv"], params["b_i"], params["b_misc"],
      adv.astype(jnp.float32),
      params["d_w1"], params["d_w2"], params["d_b1"], params["d_b2"])

    feats = slab[:, :H]
    probs = slab[:, H:H + C1]
    return probs, feats


# ----------------------------------- main ------------------------------------
if __name__ == "__main__":
    nclasses = 3
    B, S = 2, 8
    M_adv = 2

    key = jax.random.PRNGKey(0)
    k_par, k_ids, k_adv = jax.random.split(key, 3)

    params = init_params(k_par, nclasses)

    input_ids = jax.random.randint(k_ids, (B, S), 0, VOCAB, dtype=jnp.int32)
    token_type_ids = jnp.zeros((B, S), dtype=jnp.int32)
    attention_mask = jnp.ones((B, S), dtype=jnp.int32).at[1, S - 1].set(0)  # pad last tok of seq 1
    adv = jax.random.normal(k_adv, (M_adv, Config.bert_features), dtype=jnp.float32)

    inputs = {
        "input_ids": input_ids,
        "token_type_ids": token_type_ids,
        "attention_mask": attention_mask,
    }

    probs, all_features = gan_bert_forward(params, inputs, adv)
    jax.block_until_ready((probs, all_features))

    assert probs.shape == (B + M_adv, nclasses + 1)
    assert all_features.shape == (B + M_adv, Config.bert_features)
    assert bool(jnp.all(jnp.isfinite(probs)))
    assert bool(jnp.allclose(jnp.sum(probs, axis=-1), 1.0, atol=1e-5))
    print("KERNEL_OK")
</pallas_src>

<mosaic_0001>
module attributes {stable_mosaic.version = 11 : i64} {
  func.func @ganbert_kernel(%arg0: i32, %arg1: memref<16x32xf32, #tpu.memory_space<vmem>>, %arg2: memref<2x1x8xf32, #tpu.memory_space<vmem>>, %arg3: memref<2x32xf32, #tpu.memory_space<vmem>>, %arg4: memref<2x32x96xbf16, #tpu.memory_space<vmem>>, %arg5: memref<2x96x32xbf16, #tpu.memory_space<vmem>>, %arg6: memref<2x32x64xbf16, #tpu.memory_space<vmem>>, %arg7: memref<2x1x96xf32, #tpu.memory_space<vmem>>, %arg8: memref<2x1x64xf32, #tpu.memory_space<vmem>>, %arg9: memref<2x6x32xf32, #tpu.memory_space<vmem>>, %arg10: memref<2x32xf32, #tpu.memory_space<vmem>>, %arg11: memref<32x64xbf16, #tpu.memory_space<vmem>>, %arg12: memref<64x4xbf16, #tpu.memory_space<vmem>>, %arg13: memref<1x64xf32, #tpu.memory_space<vmem>>, %arg14: memref<1x4xf32, #tpu.memory_space<vmem>>, %arg15: memref<4x128xf32, #tpu.memory_space<vmem>>) attributes {dimension_semantics = [#tpu.dimension_semantics<arbitrary>], iteration_bounds = array<i64: 1>, scalar_prefetch = 0 : i64, scratch_operands = 0 : i64, tpu.core_type = #tpu.core_type<tc>, window_params = [{pipeline_mode = #tpu.pipeline_mode<synchronous>, transform_indices = @transform_0, window_bounds = array<i64: 16, 32>}, {pipeline_mode = #tpu.pipeline_mode<synchronous>, transform_indices = @transform_1, window_bounds = array<i64: 2, 1, 8>}, {pipeline_mode = #tpu.pipeline_mode<synchronous>, transform_indices = @transform_2, window_bounds = array<i64: 2, 32>}, {pipeline_mode = #tpu.pipeline_mode<synchronous>, transform_indices = @transform_3, window_bounds = array<i64: 2, 32, 96>}, {pipeline_mode = #tpu.pipeline_mode<synchronous>, transform_indices = @transform_4, window_bounds = array<i64: 2, 96, 32>}, {pipeline_mode = #tpu.pipeline_mode<synchronous>, transform_indices = @transform_5, window_bounds = array<i64: 2, 32, 64>}, {pipeline_mode = #tpu.pipeline_mode<synchronous>, transform_indices = @transform_6, window_bounds = array<i64: 2, 1, 96>}, {pipeline_mode = #tpu.pipeline_mode<synchronous>, transform_indices = @transform_7, window_bounds = array<i64: 2, 1, 64>}, {pipeline_mode = #tpu.pipeline_mode<synchronous>, transform_indices = @transform_8, window_bounds = array<i64: 2, 6, 32>}, {pipeline_mode = #tpu.pipeline_mode<synchronous>, transform_indices = @transform_9, window_bounds = array<i64: 2, 32>}, {pipeline_mode = #tpu.pipeline_mode<synchronous>, transform_indices = @transform_10, window_bounds = array<i64: 32, 64>}, {pipeline_mode = #tpu.pipeline_mode<synchronous>, transform_indices = @transform_11, window_bounds = array<i64: 64, 4>}, {pipeline_mode = #tpu.pipeline_mode<synchronous>, transform_indices = @transform_12, window_bounds = array<i64: 1, 64>}, {pipeline_mode = #tpu.pipeline_mode<synchronous>, transform_indices = @transform_13, window_bounds = array<i64: 1, 4>}, {pipeline_mode = #tpu.pipeline_mode<synchronous>, transform_indices = @transform_14, window_bounds = array<i64: 4, 128>}]} {
    %c0 = arith.constant 0 : index
    %c0_0 = arith.constant 0 : index
    %0 = vector.load %arg1[%c0, %c0_0] : memref<16x32xf32, #tpu.memory_space<vmem>>, vector<16x32xf32>
    %c0_1 = arith.constant 0 : index
    %c0_2 = arith.constant 0 : index
    %1 = vector.load %arg3[%c0_1, %c0_2] : memref<2x32xf32, #tpu.memory_space<vmem>>, vector<1x32xf32>
    %c1 = arith.constant 1 : index
    %c0_3 = arith.constant 0 : index
    %2 = vector.load %arg3[%c1, %c0_3] : memref<2x32xf32, #tpu.memory_space<vmem>>, vector<1x32xf32>
    %cst = arith.constant dense<0.000000e+00> : vector<16xf32>
    %3 = vector.multi_reduction <add>, %0, %cst [1] : vector<16x32xf32> to vector<16xf32>
    %4 = vector.shape_cast %3 : vector<16xf32> to vector<16x1xf32>
    %cst_4 = arith.constant 3.200000e+01 : f32
    %5 = vector.broadcast %cst_4 : f32 to vector<16x1xf32>
    %6 = arith.divf %4, %5 : vector<16x1xf32>
    %7 = vector.broadcast %6 : vector<16x1xf32> to vector<16x32xf32>
    %8 = arith.subf %0, %7 : vector<16x32xf32>
    %9 = arith.mulf %8, %8 : vector<16x32xf32>
    %cst_5 = arith.constant dense<0.000000e+00> : vector<16xf32>
    %10 = vector.multi_reduction <add>, %9, %cst_5 [1] : vector<16x32xf32> to vector<16xf32>
    %11 = vector.shape_cast %10 : vector<16xf32> to vector<16x1xf32>
    %cst_6 = arith.constant 3.200000e+01 : f32
    %12 = vector.broadcast %cst_6 : f32 to vector<16x1xf32>
    %13 = arith.divf %11, %12 : vector<16x1xf32>
    %14 = vector.broadcast %6 : vector<16x1xf32> to vector<16x32xf32>
    %15 = arith.subf %0, %14 : vector<16x32xf32>
    %cst_7 = arith.constant 9.99999996E-13 : f32
    %16 = vector.broadcast %cst_7 : f32 to vector<16x1xf32>
    %17 = arith.addf %13, %16 : vector<16x1xf32>
    %18 = math.rsqrt %17 : vector<16x1xf32>
    %19 = vector.broadcast %18 : vector<16x1xf32> to vector<16x32xf32>
    %20 = arith.mulf %15, %19 : vector<16x32xf32>
    %21 = vector.broadcast %1 : vector<1x32xf32> to vector<16x32xf32>
    %22 = arith.mulf %20, %21 : vector<16x32xf32>
    %23 = vector.broadcast %2 : vector<1x32xf32> to vector<16x32xf32>
    %24 = arith.addf %22, %23 : vector<16x32xf32>
    %c0_8 = arith.constant 0 : index
    %c0_9 = arith.constant 0 : index
    %c0_10 = arith.constant 0 : index
    %25 = vector.load %arg2[%c0_8, %c0_9, %c0_10] : memref<2x1x8xf32, #tpu.memory_space<vmem>>, vector<2x1x8xf32>
    %26 = tpu.concatenate %25, %25 in 0 : vector<2x1x8xf32>, vector<2x1x8xf32> -> vector<4x1x8xf32>
    %27 = vector.shape_cast %26 : vector<4x1x8xf32> to vector<4x1x8xf32>
    %28 = vector.broadcast %27 : vector<4x1x8xf32> to vector<4x8x8xf32>
    %29 = arith.truncf %24 : vector<16x32xf32> to vector<16x32xbf16>
    %c0_11 = arith.constant 0 : index
    %c0_12 = arith.constant 0 : index
    %c0_13 = arith.constant 0 : index
    %30 = vector.load %arg4[%c0_11, %c0_12, %c0_13] : memref<2x32x96xbf16, #tpu.memory_space<vmem>>, vector<1x32x96xbf16>
    %31 = vector.shape_cast %30 : vector<1x32x96xbf16> to vector<32x96xbf16>
    %cst_14 = arith.constant dense<0.000000e+00> : vector<16x96xf32>
    %32 = tpu.matmul %29, %31, %cst_14 {dimension_numbers = #tpu.dot_dimension_numbers<[1], [0], [0], [1], [0, 0, 1, 1], [], []>} : vector<16x32xbf16>, vector<32x96xbf16>, vector<16x96xf32> -> vector<16x96xf32>
    %c0_15 = arith.constant 0 : index
    %c0_16 = arith.constant 0 : index
    %c0_17 = arith.constant 0 : index
    %33 = vector.load %arg7[%c0_15, %c0_16, %c0_17] : memref<2x1x96xf32, #tpu.memory_space<vmem>>, vector<1x1x96xf32>
    %34 = vector.shape_cast %33 : vector<1x1x96xf32> to vector<1x96xf32>
    %35 = vector.broadcast %34 : vector<1x96xf32> to vector<16x96xf32>
    %36 = arith.addf %32, %35 : vector<16x96xf32>
    %37 = arith.truncf %36 : vector<16x96xf32> to vector<16x96xbf16>
    %38 = vector.extract_strided_slice %37 {offsets = [0, 0], sizes = [16, 16], strides = [1, 1]} : vector<16x96xbf16> to vector<16x16xbf16>
    %39 = vector.shape_cast %38 : vector<16x16xbf16> to vector<2x8x16xbf16>
    %40 = vector.extract_strided_slice %37 {offsets = [0, 16], sizes = [16, 16], strides = [1, 1]} : vector<16x96xbf16> to vector<16x16xbf16>
    %41 = vector.shape_cast %40 : vector<16x16xbf16> to vector<2x8x16xbf16>
    %42 = tpu.concatenate %39, %41 in 0 : vector<2x8x16xbf16>, vector<2x8x16xbf16> -> vector<4x8x16xbf16>
    %43 = vector.extract_strided_slice %37 {offsets = [0, 32], sizes = [16, 16], strides = [1, 1]} : vector<16x96xbf16> to vector<16x16xbf16>
    %44 = vector.shape_cast %43 : vector<16x16xbf16> to vector<2x8x16xbf16>
    %45 = vector.extract_strided_slice %37 {offsets = [0, 48], sizes = [16, 16], strides = [1, 1]} : vector<16x96xbf16> to vector<16x16xbf16>
    %46 = vector.shape_cast %45 : vector<16x16xbf16> to vector<2x8x16xbf16>
    %47 = tpu.concatenate %44, %46 in 0 : vector<2x8x16xbf16>, vector<2x8x16xbf16> -> vector<4x8x16xbf16>
    %48 = vector.extract_strided_slice %37 {offsets = [0, 64], sizes = [16, 16], strides = [1, 1]} : vector<16x96xbf16> to vector<16x16xbf16>
    %49 = vector.shape_cast %48 : vector<16x16xbf16> to vector<2x8x16xbf16>
    %50 = vector.extract_strided_slice %37 {offsets = [0, 80], sizes = [16, 16], strides = [1, 1]} : vector<16x96xbf16> to vector<16x16xbf16>
    %51 = vector.shape_cast %50 : vector<16x16xbf16> to vector<2x8x16xbf16>
    %52 = tpu.concatenate %49, %51 in 0 : vector<2x8x16xbf16>, vector<2x8x16xbf16> -> vector<4x8x16xbf16>
    "tpu.trace_start"() <{level = 10 : i32, message = "bqd,bkd->bqk"}> : () -> ()
    %cst_18 = arith.constant dense<0.000000e+00> : vector<4x8x8xf32>
    %53 = tpu.matmul %42, %47, %cst_18 {dimension_numbers = #tpu.dot_dimension_numbers<[2], [2], [1], [1], [0, 0, 0, 1, 1, 1], [0], [0]>} : vector<4x8x16xbf16>, vector<4x8x16xbf16>, vector<4x8x8xf32> -> vector<4x8x8xf32>
    "tpu.trace_stop"() : () -> ()
    %cst_19 = arith.constant 2.500000e-01 : f32
    %54 = vector.broadcast %cst_19 : f32 to vector<4x8x8xf32>
    %55 = arith.mulf %53, %54 : vector<4x8x8xf32>
    %56 = arith.addf %55, %28 : vector<4x8x8xf32>
    %cst_20 = arith.constant dense<0xFF800000> : vector<4x8xf32>
    %57 = vector.multi_reduction <maximumf>, %56, %cst_20 [2] : vector<4x8x8xf32> to vector<4x8xf32>
    %58 = vector.shape_cast %57 : vector<4x8xf32> to vector<4x8x1xf32>
    %59 = vector.broadcast %58 : vector<4x8x1xf32> to vector<4x8x8xf32>
    %60 = arith.subf %56, %59 : vector<4x8x8xf32>
    %61 = math.exp %60 : vector<4x8x8xf32>
    %cst_21 = arith.constant dense<0.000000e+00> : vector<4x8xf32>
    %62 = vector.multi_reduction <add>, %61, %cst_21 [2] : vector<4x8x8xf32> to vector<4x8xf32>
    %63 = vector.shape_cast %62 : vector<4x8xf32> to vector<4x8x1xf32>
    %64 = tpu.reciprocal %63 {approx = true} : vector<4x8x1xf32> -> vector<4x8x1xf32>
    %65 = vector.broadcast %64 : vector<4x8x1xf32> to vector<4x8x8xf32>
    %66 = arith.mulf %61, %65 : vector<4x8x8xf32>
    %67 = arith.truncf %66 : vector<4x8x8xf32> to vector<4x8x8xbf16>
    "tpu.trace_start"() <{level = 10 : i32, message = "bqk,bkd->bqd"}> : () -> ()
    %cst_22 = arith.constant dense<0.000000e+00> : vector<4x8x16xf32>
    %68 = tpu.matmul %67, %52, %cst_22 {dimension_numbers = #tpu.dot_dimension_numbers<[2], [1], [1], [2], [0, 0, 0, 1, 1, 2], [0], [0]>} : vector<4x8x8xbf16>, vector<4x8x16xbf16>, vector<4x8x16xf32> -> vector<4x8x16xf32>
    "tpu.trace_stop"() : () -> ()
    %c0_23 = arith.constant 0 : index
    %c0_24 = arith.constant 0 : index
    %c0_25 = arith.constant 0 : index
    %69 = vector.load %arg5[%c0_23, %c0_24, %c0_25] : memref<2x96x32xbf16, #tpu.memory_space<vmem>>, vector<1x96x32xbf16>
    %70 = vector.shape_cast %69 : vector<1x96x32xbf16> to vector<96x32xbf16>
    %c0_26 = arith.constant 0 : index
    %c0_27 = arith.constant 0 : index
    %c0_28 = arith.constant 0 : index
    %71 = vector.load %arg9[%c0_26, %c0_27, %c0_28] : memref<2x6x32xf32, #tpu.memory_space<vmem>>, vector<1x6x32xf32>
    %72 = vector.shape_cast %71 : vector<1x6x32xf32> to vector<6x32xf32>
    %73 = vector.extract_strided_slice %72 {offsets = [0, 0], sizes = [1, 32], strides = [1, 1]} : vector<6x32xf32> to vector<1x32xf32>
    %74 = vector.extract_strided_slice %72 {offsets = [1, 0], sizes = [1, 32], strides = [1, 1]} : vector<6x32xf32> to vector<1x32xf32>
    %75 = vector.extract_strided_slice %72 {offsets = [2, 0], sizes = [1, 32], strides = [1, 1]} : vector<6x32xf32> to vector<1x32xf32>
    %76 = vector.extract_strided_slice %72 {offsets = [3, 0], sizes = [1, 32], strides = [1, 1]} : vector<6x32xf32> to vector<1x32xf32>
    %77 = vector.extract_strided_slice %72 {offsets = [4, 0], sizes = [1, 32], strides = [1, 1]} : vector<6x32xf32> to vector<1x32xf32>
    %78 = vector.extract_strided_slice %72 {offsets = [5, 0], sizes = [1, 32], strides = [1, 1]} : vector<6x32xf32> to vector<1x32xf32>
    %79 = vector.extract_strided_slice %68 {offsets = [0, 0, 0], sizes = [2, 8, 16], strides = [1, 1, 1]} : vector<4x8x16xf32> to vector<2x8x16xf32>
    %80 = vector.shape_cast %79 : vector<2x8x16xf32> to vector<16x16xf32>
    %81 = arith.truncf %80 : vector<16x16xf32> to vector<16x16xbf16>
    %82 = vector.extract_strided_slice %70 {offsets = [0, 0], sizes = [16, 32], strides = [1, 1]} : vector<96x32xbf16> to vector<16x32xbf16>
    %cst_29 = arith.constant dense<0.000000e+00> : vector<16x32xf32>
    %83 = tpu.matmul %81, %82, %cst_29 {dimension_numbers = #tpu.dot_dimension_numbers<[1], [0], [0], [1], [0, 0, 1, 1], [], []>} : vector<16x16xbf16>, vector<16x32xbf16>, vector<16x32xf32> -> vector<16x32xf32>
    %84 = vector.broadcast %73 : vector<1x32xf32> to vector<16x32xf32>
    %85 = arith.addf %84, %83 : vector<16x32xf32>
    %86 = vector.extract_strided_slice %68 {offsets = [2, 0, 0], sizes = [2, 8, 16], strides = [1, 1, 1]} : vector<4x8x16xf32> to vector<2x8x16xf32>
    %87 = vector.shape_cast %86 : vector<2x8x16xf32> to vector<16x16xf32>
    %88 = arith.truncf %87 : vector<16x16xf32> to vector<16x16xbf16>
    %89 = vector.extract_strided_slice %70 {offsets = [16, 0], sizes = [16, 32], strides = [1, 1]} : vector<96x32xbf16> to vector<16x32xbf16>
    %cst_30 = arith.constant dense<0.000000e+00> : vector<16x32xf32>
    %90 = tpu.matmul %88, %89, %cst_30 {dimension_numbers = #tpu.dot_dimension_numbers<[1], [0], [0], [1], [0, 0, 1, 1], [], []>} : vector<16x16xbf16>, vector<16x32xbf16>, vector<16x32xf32> -> vector<16x32xf32>
    %91 = arith.addf %85, %90 : vector<16x32xf32>
    %92 = arith.addf %91, %24 : vector<16x32xf32>
    %cst_31 = arith.constant dense<0.000000e+00> : vector<16xf32>
    %93 = vector.multi_reduction <add>, %92, %cst_31 [1] : vector<16x32xf32> to vector<16xf32>
    %94 = vector.shape_cast %93 : vector<16xf32> to vector<16x1xf32>
    %cst_32 = arith.constant 3.200000e+01 : f32
    %95 = vector.broadcast %cst_32 : f32 to vector<16x1xf32>
    %96 = arith.divf %94, %95 : vector<16x1xf32>
    %97 = vector.broadcast %96 : vector<16x1xf32> to vector<16x32xf32>
    %98 = arith.subf %92, %97 : vector<16x32xf32>
    %99 = arith.mulf %98, %98 : vector<16x32xf32>
    %cst_33 = arith.constant dense<0.000000e+00> : vector<16xf32>
    %100 = vector.multi_reduction <add>, %99, %cst_33 [1] : vector<16x32xf32> to vector<16xf32>
    %101 = vector.shape_cast %100 : vector<16xf32> to vector<16x1xf32>
    %cst_34 = arith.constant 3.200000e+01 : f32
    %102 = vector.broadcast %cst_34 : f32 to vector<16x1xf32>
    %103 = arith.divf %101, %102 : vector<16x1xf32>
    %104 = vector.broadcast %96 : vector<16x1xf32> to vector<16x32xf32>
    %105 = arith.subf %92, %104 : vector<16x32xf32>
    %cst_35 = arith.constant 9.99999996E-13 : f32
    %106 = vector.broadcast %cst_35 : f32 to vector<16x1xf32>
    %107 = arith.addf %103, %106 : vector<16x1xf32>
    %108 = math.rsqrt %107 : vector<16x1xf32>
    %109 = vector.broadcast %108 : vector<16x1xf32> to vector<16x32xf32>
    %110 = arith.mulf %105, %109 : vector<16x32xf32>
    %111 = vector.broadcast %75 : vector<1x32xf32> to vector<16x32xf32>
    %112 = arith.mulf %110, %111 : vector<16x32xf32>
    %113 = vector.broadcast %76 : vector<1x32xf32> to vector<16x32xf32>
    %114 = arith.addf %112, %113 : vector<16x32xf32>
    %115 = arith.truncf %114 : vector<16x32xf32> to vector<16x32xbf16>
    %c0_36 = arith.constant 0 : index
    %c0_37 = arith.constant 0 : index
    %c0_38 = arith.constant 0 : index
    %116 = vector.load %arg6[%c0_36, %c0_37, %c0_38] : memref<2x32x64xbf16, #tpu.memory_space<vmem>>, vector<1x32x64xbf16>
    %117 = vector.shape_cast %116 : vector<1x32x64xbf16> to vector<32x64xbf16>
    %cst_39 = arith.constant dense<0.000000e+00> : vector<16x64xf32>
    %118 = tpu.matmul %115, %117, %cst_39 {dimension_numbers = #tpu.dot_dimension_numbers<[1], [0], [0], [1], [0, 0, 1, 1], [], []>} : vector<16x32xbf16>, vector<32x64xbf16>, vector<16x64xf32> -> vector<16x64xf32>
    %c0_40 = arith.constant 0 : index
    %c0_41 = arith.constant 0 : index
    %c0_42 = arith.constant 0 : index
    %119 = vector.load %arg8[%c0_40, %c0_41, %c0_42] : memref<2x1x64xf32, #tpu.memory_space<vmem>>, vector<1x1x64xf32>
    %120 = vector.shape_cast %119 : vector<1x1x64xf32> to vector<1x64xf32>
    %121 = vector.broadcast %120 : vector<1x64xf32> to vector<16x64xf32>
    %122 = arith.addf %118, %121 : vector<16x64xf32>
    %cst_43 = arith.constant 5.000000e-01 : f32
    %123 = vector.broadcast %cst_43 : f32 to vector<16x64xf32>
    %124 = arith.mulf %123, %122 : vector<16x64xf32>
    %cst_44 = arith.constant 4.471500e-02 : f32
    %125 = vector.broadcast %cst_44 : f32 to vector<16x64xf32>
    %126 = arith.mulf %125, %122 : vector<16x64xf32>
    %127 = arith.mulf %126, %122 : vector<16x64xf32>
    %128 = arith.mulf %127, %122 : vector<16x64xf32>
    %129 = arith.addf %122, %128 : vector<16x64xf32>
    %cst_45 = arith.constant 0.797884583 : f32
    %130 = vector.broadcast %cst_45 : f32 to vector<16x64xf32>
    %131 = arith.mulf %130, %129 : vector<16x64xf32>
    %132 = math.tanh %131 : vector<16x64xf32>
    %cst_46 = arith.constant 1.000000e+00 : f32
    %133 = vector.broadcast %cst_46 : f32 to vector<16x64xf32>
    %134 = arith.addf %133, %132 : vector<16x64xf32>
    %135 = arith.mulf %124, %134 : vector<16x64xf32>
    %136 = arith.truncf %135 : vector<16x64xf32> to vector<16x64xbf16>
    %137 = vector.extract_strided_slice %70 {offsets = [32, 0], sizes = [64, 32], strides = [1, 1]} : vector<96x32xbf16> to vector<64x32xbf16>
    %cst_47 = arith.constant dense<0.000000e+00> : vector<16x32xf32>
    %138 = tpu.matmul %136, %137, %cst_47 {dimension_numbers = #tpu.dot_dimension_numbers<[1], [0], [0], [1], [0, 0, 1, 1], [], []>} : vector<16x64xbf16>, vector<64x32xbf16>, vector<16x32xf32> -> vector<16x32xf32>
    %139 = vector.broadcast %74 : vector<1x32xf32> to vector<16x32xf32>
    %140 = arith.addf %138, %139 : vector<16x32xf32>
    %141 = arith.addf %140, %114 : vector<16x32xf32>
    %cst_48 = arith.constant dense<0.000000e+00> : vector<16xf32>
    %142 = vector.multi_reduction <add>, %141, %cst_48 [1] : vector<16x32xf32> to vector<16xf32>
    %143 = vector.shape_cast %142 : vector<16xf32> to vector<16x1xf32>
    %cst_49 = arith.constant 3.200000e+01 : f32
    %144 = vector.broadcast %cst_49 : f32 to vector<16x1xf32>
    %145 = arith.divf %143, %144 : vector<16x1xf32>
    %146 = vector.broadcast %145 : vector<16x1xf32> to vector<16x32xf32>
    %147 = arith.subf %141, %146 : vector<16x32xf32>
    %148 = arith.mulf %147, %147 : vector<16x32xf32>
    %cst_50 = arith.constant dense<0.000000e+00> : vector<16xf32>
    %149 = vector.multi_reduction <add>, %148, %cst_50 [1] : vector<16x32xf32> to vector<16xf32>
    %150 = vector.shape_cast %149 : vector<16xf32> to vector<16x1xf32>
    %cst_51 = arith.constant 3.200000e+01 : f32
    %151 = vector.broadcast %cst_51 : f32 to vector<16x1xf32>
    %152 = arith.divf %150, %151 : vector<16x1xf32>
    %153 = vector.broadcast %145 : vector<16x1xf32> to vector<16x32xf32>
    %154 = arith.subf %141, %153 : vector<16x32xf32>
    %cst_52 = arith.constant 9.99999996E-13 : f32
    %155 = vector.broadcast %cst_52 : f32 to vector<16x1xf32>
    %156 = arith.addf %152, %155 : vector<16x1xf32>
    %157 = math.rsqrt %156 : vector<16x1xf32>
    %158 = vector.broadcast %157 : vector<16x1xf32> to vector<16x32xf32>
    %159 = arith.mulf %154, %158 : vector<16x32xf32>
    %160 = vector.broadcast %77 : vector<1x32xf32> to vector<16x32xf32>
    %161 = arith.mulf %159, %160 : vector<16x32xf32>
    %162 = vector.broadcast %78 : vector<1x32xf32> to vector<16x32xf32>
    %163 = arith.addf %161, %162 : vector<16x32xf32>
    %164 = arith.truncf %163 : vector<16x32xf32> to vector<16x32xbf16>
    %c1_53 = arith.constant 1 : index
    %c0_54 = arith.constant 0 : index
    %c0_55 = arith.constant 0 : index
    %165 = vector.load %arg4[%c1_53, %c0_54, %c0_55] : memref<2x32x96xbf16, #tpu.memory_space<vmem>>, vector<1x32x96xbf16>
    %166 = vector.shape_cast %165 : vector<1x32x96xbf16> to vector<32x96xbf16>
    %cst_56 = arith.constant dense<0.000000e+00> : vector<16x96xf32>
    %167 = tpu.matmul %164, %166, %cst_56 {dimension_numbers = #tpu.dot_dimension_numbers<[1], [0], [0], [1], [0, 0, 1, 1], [], []>} : vector<16x32xbf16>, vector<32x96xbf16>, vector<16x96xf32> -> vector<16x96xf32>
    %c1_57 = arith.constant 1 : index
    %c0_58 = arith.constant 0 : index
    %c0_59 = arith.constant 0 : index
    %168 = vector.load %arg7[%c1_57, %c0_58, %c0_59] : memref<2x1x96xf32, #tpu.memory_space<vmem>>, vector<1x1x96xf32>
    %169 = vector.shape_cast %168 : vector<1x1x96xf32> to vector<1x96xf32>
    %170 = vector.broadcast %169 : vector<1x96xf32> to vector<16x96xf32>
    %171 = arith.addf %167, %170 : vector<16x96xf32>
    %172 = arith.truncf %171 : vector<16x96xf32> to vector<16x96xbf16>
    %173 = vector.extract_strided_slice %172 {offsets = [0, 0], sizes = [16, 16], strides = [1, 1]} : vector<16x96xbf16> to vector<16x16xbf16>
    %174 = vector.shape_cast %173 : vector<16x16xbf16> to vector<2x8x16xbf16>
    %175 = vector.extract_strided_slice %172 {offsets = [0, 16], sizes = [16, 16], strides = [1, 1]} : vector<16x96xbf16> to vector<16x16xbf16>
    %176 = vector.shape_cast %175 : vector<16x16xbf16> to vector<2x8x16xbf16>
    %177 = tpu.concatenate %174, %176 in 0 : vector<2x8x16xbf16>, vector<2x8x16xbf16> -> vector<4x8x16xbf16>
    %178 = vector.extract_strided_slice %172 {offsets = [0, 32], sizes = [16, 16], strides = [1, 1]} : vector<16x96xbf16> to vector<16x16xbf16>
    %179 = vector.shape_cast %178 : vector<16x16xbf16> to vector<2x8x16xbf16>
    %180 = vector.extract_strided_slice %172 {offsets = [0, 48], sizes = [16, 16], strides = [1, 1]} : vector<16x96xbf16> to vector<16x16xbf16>
    %181 = vector.shape_cast %180 : vector<16x16xbf16> to vector<2x8x16xbf16>
    %182 = tpu.concatenate %179, %181 in 0 : vector<2x8x16xbf16>, vector<2x8x16xbf16> -> vector<4x8x16xbf16>
    %183 = vector.extract_strided_slice %172 {offsets = [0, 64], sizes = [16, 16], strides = [1, 1]} : vector<16x96xbf16> to vector<16x16xbf16>
    %184 = vector.shape_cast %183 : vector<16x16xbf16> to vector<2x8x16xbf16>
    %185 = vector.extract_strided_slice %172 {offsets = [0, 80], sizes = [16, 16], strides = [1, 1]} : vector<16x96xbf16> to vector<16x16xbf16>
    %186 = vector.shape_cast %185 : vector<16x16xbf16> to vector<2x8x16xbf16>
    %187 = tpu.concatenate %184, %186 in 0 : vector<2x8x16xbf16>, vector<2x8x16xbf16> -> vector<4x8x16xbf16>
    "tpu.trace_start"() <{level = 10 : i32, message = "bqd,bkd->bqk"}> : () -> ()
    %cst_60 = arith.constant dense<0.000000e+00> : vector<4x8x8xf32>
    %188 = tpu.matmul %177, %182, %cst_60 {dimension_numbers = #tpu.dot_dimension_numbers<[2], [2], [1], [1], [0, 0, 0, 1, 1, 1], [0], [0]>} : vector<4x8x16xbf16>, vector<4x8x16xbf16>, vector<4x8x8xf32> -> vector<4x8x8xf32>
    "tpu.trace_stop"() : () -> ()
    %cst_61 = arith.constant 2.500000e-01 : f32
    %189 = vector.broadcast %cst_61 : f32 to vector<4x8x8xf32>
    %190 = arith.mulf %188, %189 : vector<4x8x8xf32>
    %191 = arith.addf %190, %28 : vector<4x8x8xf32>
    %cst_62 = arith.constant dense<0xFF800000> : vector<4x8xf32>
    %192 = vector.multi_reduction <maximumf>, %191, %cst_62 [2] : vector<4x8x8xf32> to vector<4x8xf32>
    %193 = vector.shape_cast %192 : vector<4x8xf32> to vector<4x8x1xf32>
    %194 = vector.broadcast %193 : vector<4x8x1xf32> to vector<4x8x8xf32>
    %195 = arith.subf %191, %194 : vector<4x8x8xf32>
    %196 = math.exp %195 : vector<4x8x8xf32>
    %cst_63 = arith.constant dense<0.000000e+00> : vector<4x8xf32>
    %197 = vector.multi_reduction <add>, %196, %cst_63 [2] : vector<4x8x8xf32> to vector<4x8xf32>
    %198 = vector.shape_cast %197 : vector<4x8xf32> to vector<4x8x1xf32>
    %199 = tpu.reciprocal %198 {approx = true} : vector<4x8x1xf32> -> vector<4x8x1xf32>
    %200 = vector.broadcast %199 : vector<4x8x1xf32> to vector<4x8x8xf32>
    %201 = arith.mulf %196, %200 : vector<4x8x8xf32>
    %202 = arith.truncf %201 : vector<4x8x8xf32> to vector<4x8x8xbf16>
    "tpu.trace_start"() <{level = 10 : i32, message = "bqk,bkd->bqd"}> : () -> ()
    %cst_64 = arith.constant dense<0.000000e+00> : vector<4x8x16xf32>
    %203 = tpu.matmul %202, %187, %cst_64 {dimension_numbers = #tpu.dot_dimension_numbers<[2], [1], [1], [2], [0, 0, 0, 1, 1, 2], [0], [0]>} : vector<4x8x8xbf16>, vector<4x8x16xbf16>, vector<4x8x16xf32> -> vector<4x8x16xf32>
    "tpu.trace_stop"() : () -> ()
    %c1_65 = arith.constant 1 : index
    %c0_66 = arith.constant 0 : index
    %c0_67 = arith.constant 0 : index
    %204 = vector.load %arg5[%c1_65, %c0_66, %c0_67] : memref<2x96x32xbf16, #tpu.memory_space<vmem>>, vector<1x96x32xbf16>
    %205 = vector.shape_cast %204 : vector<1x96x32xbf16> to vector<96x32xbf16>
    %c1_68 = arith.constant 1 : index
    %c0_69 = arith.constant 0 : index
    %c0_70 = arith.constant 0 : index
    %206 = vector.load %arg9[%c1_68, %c0_69, %c0_70] : memref<2x6x32xf32, #tpu.memory_space<vmem>>, vector<1x6x32xf32>
    %207 = vector.shape_cast %206 : vector<1x6x32xf32> to vector<6x32xf32>
    %208 = vector.extract_strided_slice %207 {offsets = [0, 0], sizes = [1, 32], strides = [1, 1]} : vector<6x32xf32> to vector<1x32xf32>
    %209 = vector.extract_strided_slice %207 {offsets = [1, 0], sizes = [1, 32], strides = [1, 1]} : vector<6x32xf32> to vector<1x32xf32>
    %210 = vector.extract_strided_slice %207 {offsets = [2, 0], sizes = [1, 32], strides = [1, 1]} : vector<6x32xf32> to vector<1x32xf32>
    %211 = vector.extract_strided_slice %207 {offsets = [3, 0], sizes = [1, 32], strides = [1, 1]} : vector<6x32xf32> to vector<1x32xf32>
    %212 = vector.extract_strided_slice %207 {offsets = [4, 0], sizes = [1, 32], strides = [1, 1]} : vector<6x32xf32> to vector<1x32xf32>
    %213 = vector.extract_strided_slice %207 {offsets = [5, 0], sizes = [1, 32], strides = [1, 1]} : vector<6x32xf32> to vector<1x32xf32>
    %214 = vector.extract_strided_slice %203 {offsets = [0, 0, 0], sizes = [2, 8, 16], strides = [1, 1, 1]} : vector<4x8x16xf32> to vector<2x8x16xf32>
    %215 = vector.shape_cast %214 : vector<2x8x16xf32> to vector<16x16xf32>
    %216 = arith.truncf %215 : vector<16x16xf32> to vector<16x16xbf16>
    %217 = vector.extract_strided_slice %205 {offsets = [0, 0], sizes = [16, 32], strides = [1, 1]} : vector<96x32xbf16> to vector<16x32xbf16>
    %cst_71 = arith.constant dense<0.000000e+00> : vector<16x32xf32>
    %218 = tpu.matmul %216, %217, %cst_71 {dimension_numbers = #tpu.dot_dimension_numbers<[1], [0], [0], [1], [0, 0, 1, 1], [], []>} : vector<16x16xbf16>, vector<16x32xbf16>, vector<16x32xf32> -> vector<16x32xf32>
    %219 = vector.broadcast %208 : vector<1x32xf32> to vector<16x32xf32>
    %220 = arith.addf %219, %218 : vector<16x32xf32>
    %221 = vector.extract_strided_slice %203 {offsets = [2, 0, 0], sizes = [2, 8, 16], strides = [1, 1, 1]} : vector<4x8x16xf32> to vector<2x8x16xf32>
    %222 = vector.shape_cast %221 : vector<2x8x16xf32> to vector<16x16xf32>
    %223 = arith.truncf %222 : vector<16x16xf32> to vector<16x16xbf16>
    %224 = vector.extract_strided_slice %205 {offsets = [16, 0], sizes = [16, 32], strides = [1, 1]} : vector<96x32xbf16> to vector<16x32xbf16>
    %cst_72 = arith.constant dense<0.000000e+00> : vector<16x32xf32>
    %225 = tpu.matmul %223, %224, %cst_72 {dimension_numbers = #tpu.dot_dimension_numbers<[1], [0], [0], [1], [0, 0, 1, 1], [], []>} : vector<16x16xbf16>, vector<16x32xbf16>, vector<16x32xf32> -> vector<16x32xf32>
    %226 = arith.addf %220, %225 : vector<16x32xf32>
    %227 = arith.addf %226, %163 : vector<16x32xf32>
    %cst_73 = arith.constant dense<0.000000e+00> : vector<16xf32>
    %228 = vector.multi_reduction <add>, %227, %cst_73 [1] : vector<16x32xf32> to vector<16xf32>
    %229 = vector.shape_cast %228 : vector<16xf32> to vector<16x1xf32>
    %cst_74 = arith.constant 3.200000e+01 : f32
    %230 = vector.broadcast %cst_74 : f32 to vector<16x1xf32>
    %231 = arith.divf %229, %230 : vector<16x1xf32>
    %232 = vector.broadcast %231 : vector<16x1xf32> to vector<16x32xf32>
    %233 = arith.subf %227, %232 : vector<16x32xf32>
    %234 = arith.mulf %233, %233 : vector<16x32xf32>
    %cst_75 = arith.constant dense<0.000000e+00> : vector<16xf32>
    %235 = vector.multi_reduction <add>, %234, %cst_75 [1] : vector<16x32xf32> to vector<16xf32>
    %236 = vector.shape_cast %235 : vector<16xf32> to vector<16x1xf32>
    %cst_76 = arith.constant 3.200000e+01 : f32
    %237 = vector.broadcast %cst_76 : f32 to vector<16x1xf32>
    %238 = arith.divf %236, %237 : vector<16x1xf32>
    %239 = vector.broadcast %231 : vector<16x1xf32> to vector<16x32xf32>
    %240 = arith.subf %227, %239 : vector<16x32xf32>
    %cst_77 = arith.constant 9.99999996E-13 : f32
    %241 = vector.broadcast %cst_77 : f32 to vector<16x1xf32>
    %242 = arith.addf %238, %241 : vector<16x1xf32>
    %243 = math.rsqrt %242 : vector<16x1xf32>
    %244 = vector.broadcast %243 : vector<16x1xf32> to vector<16x32xf32>
    %245 = arith.mulf %240, %244 : vector<16x32xf32>
    %246 = vector.broadcast %210 : vector<1x32xf32> to vector<16x32xf32>
    %247 = arith.mulf %245, %246 : vector<16x32xf32>
    %248 = vector.broadcast %211 : vector<1x32xf32> to vector<16x32xf32>
    %249 = arith.addf %247, %248 : vector<16x32xf32>
    %250 = arith.truncf %249 : vector<16x32xf32> to vector<16x32xbf16>
    %c1_78 = arith.constant 1 : index
    %c0_79 = arith.constant 0 : index
    %c0_80 = arith.constant 0 : index
    %251 = vector.load %arg6[%c1_78, %c0_79, %c0_80] : memref<2x32x64xbf16, #tpu.memory_space<vmem>>, vector<1x32x64xbf16>
    %252 = vector.shape_cast %251 : vector<1x32x64xbf16> to vector<32x64xbf16>
    %cst_81 = arith.constant dense<0.000000e+00> : vector<16x64xf32>
    %253 = tpu.matmul %250, %252, %cst_81 {dimension_numbers = #tpu.dot_dimension_numbers<[1], [0], [0], [1], [0, 0, 1, 1], [], []>} : vector<16x32xbf16>, vector<32x64xbf16>, vector<16x64xf32> -> vector<16x64xf32>
    %c1_82 = arith.constant 1 : index
    %c0_83 = arith.constant 0 : index
    %c0_84 = arith.constant 0 : index
    %254 = vector.load %arg8[%c1_82, %c0_83, %c0_84] : memref<2x1x64xf32, #tpu.memory_space<vmem>>, vector<1x1x64xf32>
    %255 = vector.shape_cast %254 : vector<1x1x64xf32> to vector<1x64xf32>
    %256 = vector.broadcast %255 : vector<1x64xf32> to vector<16x64xf32>
    %257 = arith.addf %253, %256 : vector<16x64xf32>
    %cst_85 = arith.constant 5.000000e-01 : f32
    %258 = vector.broadcast %cst_85 : f32 to vector<16x64xf32>
    %259 = arith.mulf %258, %257 : vector<16x64xf32>
    %cst_86 = arith.constant 4.471500e-02 : f32
    %260 = vector.broadcast %cst_86 : f32 to vector<16x64xf32>
    %261 = arith.mulf %260, %257 : vector<16x64xf32>
    %262 = arith.mulf %261, %257 : vector<16x64xf32>
    %263 = arith.mulf %262, %257 : vector<16x64xf32>
    %264 = arith.addf %257, %263 : vector<16x64xf32>
    %cst_87 = arith.constant 0.797884583 : f32
    %265 = vector.broadcast %cst_87 : f32 to vector<16x64xf32>
    %266 = arith.mulf %265, %264 : vector<16x64xf32>
    %267 = math.tanh %266 : vector<16x64xf32>
    %cst_88 = arith.constant 1.000000e+00 : f32
    %268 = vector.broadcast %cst_88 : f32 to vector<16x64xf32>
    %269 = arith.addf %268, %267 : vector<16x64xf32>
    %270 = arith.mulf %259, %269 : vector<16x64xf32>
    %271 = arith.truncf %270 : vector<16x64xf32> to vector<16x64xbf16>
    %272 = vector.extract_strided_slice %205 {offsets = [32, 0], sizes = [64, 32], strides = [1, 1]} : vector<96x32xbf16> to vector<64x32xbf16>
    %cst_89 = arith.constant dense<0.000000e+00> : vector<16x32xf32>
    %273 = tpu.matmul %271, %272, %cst_89 {dimension_numbers = #tpu.dot_dimension_numbers<[1], [0], [0], [1], [0, 0, 1, 1], [], []>} : vector<16x64xbf16>, vector<64x32xbf16>, vector<16x32xf32> -> vector<16x32xf32>
    %274 = vector.broadcast %209 : vector<1x32xf32> to vector<16x32xf32>
    %275 = arith.addf %273, %274 : vector<16x32xf32>
    %276 = arith.addf %275, %249 : vector<16x32xf32>
    %cst_90 = arith.constant dense<0.000000e+00> : vector<16xf32>
    %277 = vector.multi_reduction <add>, %276, %cst_90 [1] : vector<16x32xf32> to vector<16xf32>
    %278 = vector.shape_cast %277 : vector<16xf32> to vector<16x1xf32>
    %cst_91 = arith.constant 3.200000e+01 : f32
    %279 = vector.broadcast %cst_91 : f32 to vector<16x1xf32>
    %280 = arith.divf %278, %279 : vector<16x1xf32>
    %281 = vector.broadcast %280 : vector<16x1xf32> to vector<16x32xf32>
    %282 = arith.subf %276, %281 : vector<16x32xf32>
    %283 = arith.mulf %282, %282 : vector<16x32xf32>
    %cst_92 = arith.constant dense<0.000000e+00> : vector<16xf32>
    %284 = vector.multi_reduction <add>, %283, %cst_92 [1] : vector<16x32xf32> to vector<16xf32>
    %285 = vector.shape_cast %284 : vector<16xf32> to vector<16x1xf32>
    %cst_93 = arith.constant 3.200000e+01 : f32
    %286 = vector.broadcast %cst_93 : f32 to vector<16x1xf32>
    %287 = arith.divf %285, %286 : vector<16x1xf32>
    %288 = vector.broadcast %280 : vector<16x1xf32> to vector<16x32xf32>
    %289 = arith.subf %276, %288 : vector<16x32xf32>
    %cst_94 = arith.constant 9.99999996E-13 : f32
    %290 = vector.broadcast %cst_94 : f32 to vector<16x1xf32>
    %291 = arith.addf %287, %290 : vector<16x1xf32>
    %292 = math.rsqrt %291 : vector<16x1xf32>
    %293 = vector.broadcast %292 : vector<16x1xf32> to vector<16x32xf32>
    %294 = arith.mulf %289, %293 : vector<16x32xf32>
    %295 = vector.broadcast %212 : vector<1x32xf32> to vector<16x32xf32>
    %296 = arith.mulf %294, %295 : vector<16x32xf32>
    %297 = vector.broadcast %213 : vector<1x32xf32> to vector<16x32xf32>
    %298 = arith.addf %296, %297 : vector<16x32xf32>
    %299 = vector.shape_cast %298 : vector<16x32xf32> to vector<2x8x32xf32>
    %300 = vector.extract_strided_slice %299 {offsets = [0, 0, 0], sizes = [2, 1, 32], strides = [1, 1, 1]} : vector<2x8x32xf32> to vector<2x1x32xf32>
    %301 = vector.shape_cast %300 : vector<2x1x32xf32> to vector<2x32xf32>
    %c0_95 = arith.constant 0 : index
    %c0_96 = arith.constant 0 : index
    %302 = vector.load %arg10[%c0_95, %c0_96] : memref<2x32xf32, #tpu.memory_space<vmem>>, vector<2x32xf32>
    %303 = tpu.concatenate %301, %302 in 0 : vector<2x32xf32>, vector<2x32xf32> -> vector<4x32xf32>
    %304 = arith.truncf %303 : vector<4x32xf32> to vector<4x32xbf16>
    %c0_97 = arith.constant 0 : index
    %c0_98 = arith.constant 0 : index
    %305 = vector.load %arg11[%c0_97, %c0_98] : memref<32x64xbf16, #tpu.memory_space<vmem>>, vector<32x64xbf16>
    %cst_99 = arith.constant dense<0.000000e+00> : vector<4x64xf32>
    %306 = tpu.matmul %304, %305, %cst_99 {dimension_numbers = #tpu.dot_dimension_numbers<[1], [0], [0], [1], [0, 0, 1, 1], [], []>} : vector<4x32xbf16>, vector<32x64xbf16>, vector<4x64xf32> -> vector<4x64xf32>
    %c0_100 = arith.constant 0 : index
    %c0_101 = arith.constant 0 : index
    %307 = vector.load %arg13[%c0_100, %c0_101] : memref<1x64xf32, #tpu.memory_space<vmem>>, vector<1x64xf32>
    %308 = vector.broadcast %307 : vector<1x64xf32> to vector<4x64xf32>
    %309 = arith.addf %306, %308 : vector<4x64xf32>
    %cst_102 = arith.constant 0.000000e+00 : f32
    %310 = vector.broadcast %cst_102 : f32 to vector<4x64xf32>
    %311 = arith.cmpf ogt, %309, %310 : vector<4x64xf32>
    %cst_103 = arith.constant 0.00999999977 : f32
    %312 = vector.broadcast %cst_103 : f32 to vector<4x64xf32>
    %313 = arith.mulf %312, %309 : vector<4x64xf32>
    %314 = arith.select %311, %309, %313 : vector<4x64xi1>, vector<4x64xf32>
    %315 = arith.truncf %314 : vector<4x64xf32> to vector<4x64xbf16>
    %c0_104 = arith.constant 0 : index
    %c0_105 = arith.constant 0 : index
    %316 = vector.load %arg12[%c0_104, %c0_105] : memref<64x4xbf16, #tpu.memory_space<vmem>>, vector<64x4xbf16>
    %cst_106 = arith.constant dense<0.000000e+00> : vector<4x4xf32>
    %317 = tpu.matmul %315, %316, %cst_106 {dimension_numbers = #tpu.dot_dimension_numbers<[1], [0], [0], [1], [0, 0, 1, 1], [], []>} : vector<4x64xbf16>, vector<64x4xbf16>, vector<4x4xf32> -> vector<4x4xf32>
    %c0_107 = arith.constant 0 : index
    %c0_108 = arith.constant 0 : index
    %318 = vector.load %arg14[%c0_107, %c0_108] : memref<1x4xf32, #tpu.memory_space<vmem>>, vector<1x4xf32>
    %319 = vector.broadcast %318 : vector<1x4xf32> to vector<4x4xf32>
    %320 = arith.addf %317, %319 : vector<4x4xf32>
    %cst_109 = arith.constant dense<0xFF800000> : vector<4xf32>
    %321 = vector.multi_reduction <maximumf>, %320, %cst_109 [1] : vector<4x4xf32> to vector<4xf32>
    %322 = vector.shape_cast %321 : vector<4xf32> to vector<4x1xf32>
    %323 = vector.broadcast %322 : vector<4x1xf32> to vector<4x4xf32>
    %324 = arith.subf %320, %323 : vector<4x4xf32>
    %325 = math.exp %324 : vector<4x4xf32>
    %cst_110 = arith.constant dense<0.000000e+00> : vector<4xf32>
    %326 = vector.multi_reduction <add>, %325, %cst_110 [1] : vector<4x4xf32> to vector<4xf32>
    %327 = vector.shape_cast %326 : vector<4xf32> to vector<4x1xf32>
    %328 = vector.broadcast %327 : vector<4x1xf32> to vector<4x4xf32>
    %329 = arith.divf %325, %328 : vector<4x4xf32>
    %cst_111 = arith.constant 0.000000e+00 : f32
    %330 = vector.broadcast %cst_111 : f32 to vector<4x92xf32>
    %331 = tpu.concatenate %303, %329, %330 in 1 : vector<4x32xf32>, vector<4x4xf32>, vector<4x92xf32> -> vector<4x128xf32>
    %c0_112 = arith.constant 0 : index
    %c0_113 = arith.constant 0 : index
    %332 = vector.load %arg15[%c0_112, %c0_113] : memref<4x128xf32, #tpu.memory_space<vmem>>, vector<4x128xf32>
    tpu.vector_store %arg15[%c0_112, %c0_113], %331 {strides = array<i32>} : memref<4x128xf32, #tpu.memory_space<vmem>>, vector<4x128xf32>,
    return
  }
  func.func @transform_0(%arg0: i32) -> (i32, i32) {
    %c0_i32 = arith.constant 0 : i32
    %c0_i32_0 = arith.constant 0 : i32
    %c0_i32_1 = arith.constant 0 : i32
    return %c0_i32, %c0_i32_0 : i32, i32
  }
  func.func @transform_1(%arg0: i32) -> (i32, i32, i32) {
    %c0_i32 = arith.constant 0 : i32
    %c0_i32_0 = arith.constant 0 : i32
    %c0_i32_1 = arith.constant 0 : i32
    %c0_i32_2 = arith.constant 0 : i32
    return %c0_i32, %c0_i32_0, %c0_i32_1 : i32, i32, i32
  }
  func.func @transform_2(%arg0: i32) -> (i32, i32) {
    %c0_i32 = arith.constant 0 : i32
    %c0_i32_0 = arith.constant 0 : i32
    %c0_i32_1 = arith.constant 0 : i32
    return %c0_i32, %c0_i32_0 : i32, i32
  }
  func.func @transform_3(%arg0: i32) -> (i32, i32, i32) {
    %c0_i32 = arith.constant 0 : i32
    %c0_i32_0 = arith.constant 0 : i32
    %c0_i32_1 = arith.constant 0 : i32
    %c0_i32_2 = arith.constant 0 : i32
    return %c0_i32, %c0_i32_0, %c0_i32_1 : i32, i32, i32
  }
  func.func @transform_4(%arg0: i32) -> (i32, i32, i32) {
    %c0_i32 = arith.constant 0 : i32
    %c0_i32_0 = arith.constant 0 : i32
    %c0_i32_1 = arith.constant 0 : i32
    %c0_i32_2 = arith.constant 0 : i32
    return %c0_i32, %c0_i32_0, %c0_i32_1 : i32, i32, i32
  }
  func.func @transform_5(%arg0: i32) -> (i32, i32, i32) {
    %c0_i32 = arith.constant 0 : i32
    %c0_i32_0 = arith.constant 0 : i32
    %c0_i32_1 = arith.constant 0 : i32
    %c0_i32_2 = arith.constant 0 : i32
    return %c0_i32, %c0_i32_0, %c0_i32_1 : i32, i32, i32
  }
  func.func @transform_6(%arg0: i32) -> (i32, i32, i32) {
    %c0_i32 = arith.constant 0 : i32
    %c0_i32_0 = arith.constant 0 : i32
    %c0_i32_1 = arith.constant 0 : i32
    %c0_i32_2 = arith.constant 0 : i32
    return %c0_i32, %c0_i32_0, %c0_i32_1 : i32, i32, i32
  }
  func.func @transform_7(%arg0: i32) -> (i32, i32, i32) {
    %c0_i32 = arith.constant 0 : i32
    %c0_i32_0 = arith.constant 0 : i32
    %c0_i32_1 = arith.constant 0 : i32
    %c0_i32_2 = arith.constant 0 : i32
    return %c0_i32, %c0_i32_0, %c0_i32_1 : i32, i32, i32
  }
  func.func @transform_8(%arg0: i32) -> (i32, i32, i32) {
    %c0_i32 = arith.constant 0 : i32
    %c0_i32_0 = arith.constant 0 : i32
    %c0_i32_1 = arith.constant 0 : i32
    %c0_i32_2 = arith.constant 0 : i32
    return %c0_i32, %c0_i32_0, %c0_i32_1 : i32, i32, i32
  }
  func.func @transform_9(%arg0: i32) -> (i32, i32) {
    %c0_i32 = arith.constant 0 : i32
    %c0_i32_0 = arith.constant 0 : i32
    %c0_i32_1 = arith.constant 0 : i32
    return %c0_i32, %c0_i32_0 : i32, i32
  }
  func.func @transform_10(%arg0: i32) -> (i32, i32) {
    %c0_i32 = arith.constant 0 : i32
    %c0_i32_0 = arith.constant 0 : i32
    %c0_i32_1 = arith.constant 0 : i32
    return %c0_i32, %c0_i32_0 : i32, i32
  }
  func.func @transform_11(%arg0: i32) -> (i32, i32) {
    %c0_i32 = arith.constant 0 : i32
    %c0_i32_0 = arith.constant 0 : i32
    %c0_i32_1 = arith.constant 0 : i32
    return %c0_i32, %c0_i32_0 : i32, i32
  }
  func.func @transform_12(%arg0: i32) -> (i32, i32) {
    %c0_i32 = arith.constant 0 : i32
    %c0_i32_0 = arith.constant 0 : i32
    %c0_i32_1 = arith.constant 0 : i32
    return %c0_i32, %c0_i32_0 : i32, i32
  }
  func.func @transform_13(%arg0: i32) -> (i32, i32) {
    %c0_i32 = arith.constant 0 : i32
    %c0_i32_0 = arith.constant 0 : i32
    %c0_i32_1 = arith.constant 0 : i32
    return %c0_i32, %c0_i32_0 : i32, i32
  }
  func.func @transform_14(%arg0: i32) -> (i32, i32) {
    %c0_i32 = arith.constant 0 : i32
    %c0_i32_0 = arith.constant 0 : i32
    %c0_i32_1 = arith.constant 0 : i32
    return %c0_i32, %c0_i32_0 : i32, i32
  }
}

</mosaic_0001>

<bundles_post_ra>
// kernel: gan_bert_forward.1
= control target key start
LH: loop header
LB: loop body
LE: loop exit
PB: predicated region body
PF: predicated region fallthrough
CT: control target
= control target key end

     0   :  { %vm52_vm0 = vcmask 261120   ;;  %v2534_v15 = vmov 0.0   ;;  %vm2535_vm1 = vmmov 0   ;;  %s2537_s26 = smov 96   ;;  %vm186_vm2 = vcmask 130048   ;;  %s3056_s0 = inlined_call_operand.vmem [shape: f32[16,32], index: 0, kind: input, shape index: {}]   ;;  %s3057_s3 = inlined_call_operand.vmem [shape: bf16[2,32,96], index: 3, kind: input, shape index: {}]   ;;  %s3058_s2 = inlined_call_operand.vmem [shape: f32[2,32], index: 2, kind: input, shape index: {}]   ;;  %s3059_s6 = inlined_call_operand.vmem [shape: f32[2,1,96], index: 6, kind: input, shape index: {}]   ;;  %s3060_s1 = inlined_call_operand.vmem [shape: f32[2,1,8], index: 1, kind: input, shape index: {}]   ;;  %s3061_s4 = inlined_call_operand.vmem [shape: bf16[2,96,32], index: 4, kind: input, shape index: {}]   ;;  %s3062_s8 = inlined_call_operand.vmem [shape: f32[2,6,32], index: 8, kind: input, shape index: {}]   ;;  %s3063_s5 = inlined_call_operand.vmem [shape: bf16[2,32,64], index: 5, kind: input, shape index: {}]   ;;  %s3064_s7 = inlined_call_operand.vmem [shape: f32[2,1,64], index: 7, kind: input, shape index: {}]   ;;  %s3065_s10 = inlined_call_operand.vmem [shape: bf16[32,64], index: 10, kind: input, shape index: {}]   ;;  %s3066_s11 = inlined_call_operand.vmem [shape: bf16[64,4], index: 11, kind: input, shape index: {}]   ;;  %s3067_s9 = inlined_call_operand.vmem [shape: f32[2,32], index: 9, kind: input, shape index: {}]   ;;  %s3068_s12 = inlined_call_operand.vmem [shape: f32[1,64], index: 12, kind: input, shape index: {}]   ;;  %s3069_s13 = inlined_call_operand.vmem [shape: f32[1,4], index: 13, kind: input, shape index: {}]   ;;  %s3070_s14 = inlined_call_operand.vmem [shape: f32[4,128], index: 14, kind: output, shape index: {}]  }
   0x1   :  { %v48_v0 = vld [vmem:[%s3056_s0] sm:$0xff]  ;;  %v49_v1 = vld [vmem:[%s3056_s0 + $0x8] sm:$0xff]  ;;  %2242 = vmatprep.subr.bf16.mxu0 %v2534_v15  ;;  %2250 = vmatprep.subr.bf16.mxu1 %v2534_v15  ;;  %vm389_vm3 = vcmask 64512   ;;  %vm443_vm4 = vcmask 1043456   ;;  %vm909_vm5 = vcmask 523264   ;;  %vm1888_vm6 = vcmask 1041409  }
   0x2   :  { %v53_v2 = vsel %vm52_vm0, %v48_v0, 0.0  ;;  %v56_v3 = vsel %vm52_vm0, %v49_v1, 0.0  ;;  %v2444_v14 = vld [vmem:[%s3057_s3] sm:$0xff]   ;;  %v2445_v16 = vld [vmem:[%s3057_s3 + $0x8] sm:$0xff]   ;;  %2246 = vmatprep.mubr.msk.bf16.mxu0 %vm2535_vm1, %v2534_v15  ;;  %2252 = vmatprep.mubr.msk.bf16.mxu1 %vm2535_vm1, %v2534_v15  ;;  %vm1894_vm7 = vcmask 1041408   ;;  %vm2049_vm9 = vcmask 27648  }
   0x3   :  { %54 = vadd.xlane.f32.xlu0 %v53_v2  ;;  %2243 = vmatpush3.bf16.msra.mxu0 %v2444_v14  ;;  %v2073_v25 = vld [vmem:[%s3058_s2] ss:$0 sm:$0xff]  ;;  %v2074_v29 = vld [vmem:[%s3058_s2 + $0x1] ss:$0 sm:$0xff]  ;;  %s2536_s2 = smov 112   ;;  %vm2066_vm10 = vcmask 293888  }
   0x4   :  { %2244 = vmatprep.subr.bf16.mxu0 %v2534_v15  ;;  %v2077_v34 = vld [vmem:[%s3059_s6] ss:$0 sm:$0xff]  ;;  %v2708_v63 = vld [vmem:[%s3060_s1 + $0x1] ss:$0 sm:$0xff] }
   0x5   :  { %v2702_v56 = vld [vmem:[%s3060_s1] ss:$0 sm:$0xff]  ;;  %s2538_s1 = smov 64  }
   0x7   :  { %57 = vadd.xlane.f32.xlu0 %v56_v3  ;;  %2245 = vmatpush3.bf16.msra.mxu0 %v2445_v16 }
   0x8   :  { %2256 = vmatprep.subr.bf16.mxu0 %v2534_v15 }
  0x90   :  { %v55_v4 = vpop.xlane.xlu0 %54 }
  0x91   :  { %v60_v5 = vmul.f32 0.03125, %v55_v4 }
  0x93   :  { %v62_v6 = vsub.f32 %v48_v0, %v60_v5 }
  0x94   :  { %v58_v7 = vpop.xlane.xlu0 %57 }
  0x95   :  { %v61_v8 = vmul.f32 0.03125, %v58_v7  ;;  %v64_v9 = vmul.f32 %v62_v6, %v62_v6 }
  0x97   :  { %v63_v10 = vsub.f32 %v49_v1, %v61_v8  ;;  %v66_v11 = vsel %vm52_vm0, %v64_v9, 0.0 }
  0x98   :  { %67 = vadd.xlane.f32.xlu1 %v66_v11 }
  0x99   :  { %v65_v12 = vmul.f32 %v63_v10, %v63_v10 }
  0x9b   :  { %v69_v13 = vsel %vm52_vm0, %v65_v12, 0.0 }
  0x9c   :  { %70 = vadd.xlane.f32.xlu1 %v69_v13 }
 0x125   :  { %v68_v17 = vpop.xlane.xlu1 %67 }
 0x126   :  { %v72_v18 = vmul.f32 0.03125, %v68_v17 }
 0x128   :  { %v74_v19 = vadd.f32 1e-12, %v72_v18 }
 0x129   :  { %v71_v20 = vpop.xlane.xlu1 %70 }
 0x12a   :  { %2470 = vrsqrt.f32 %v74_v19  ;;  %v73_v21 = vmul.f32 0.03125, %v71_v20 }
 0x12c   :  { %v75_v22 = vadd.f32 1e-12, %v73_v21 }
 0x12e   :  { %2472 = vrsqrt.f32 %v75_v22 }
 0x134   :  { %v2471_v23 = vpop.eup %2470 }
 0x135   :  { %v78_v24 = vmul.f32 %v2471_v23, %v62_v6 }
 0x137   :  { %v84_v28 = vmul.f32 %v2073_v25, %v78_v24 }
 0x138   :  { %v2473_v26 = vpop.eup %2472 }
 0x139   :  { %v79_v27 = vmul.f32 %v2473_v26, %v63_v10  ;;  %v2645_v31 = vadd.f32 %v2074_v29, %v84_v28 }
 0x13b   :  { %v85_v30 = vmul.f32 %v2073_v25, %v79_v27 }
 0x13d   :  { %v2647_v32 = vadd.f32 %v2074_v29, %v85_v30 }
 0x13f   :  { %v106_v33 = vpack.c.bf16 %v2647_v32, %v2645_v31 }
 0x141   :  { %2247 = vmatmul.mubr.msk.bf16.vlgmr.msra.gmra.mrb[0].mxu0 %vm52_vm0, %v106_v33 }
 0x142   :  { %2258 = vmatprep.mubr.msk.bf16.mxu0 %vm2535_vm1, %v2534_v15 }
 0x214   :  { %v167_v35 = vpop.f32.mrb[0].mxu0 }
 0x215   :  { %v168_v36 = vadd.f32 %v2077_v34, %v167_v35  ;;  %v2248_v37 = vpop.f32.mrb[1].mxu0 }
 0x216   :  { %v170_v38 = vpop.f32.mrb[2].mxu0 }
 0x217   :  { %v2657_v39 = vpack.c.bf16 %v168_v36, %v168_v36  ;;  %v171_v40 = vadd.f32 %v2077_v34, %v170_v38  ;;  %v2249_v41 = vpop.f32.mrb[3].mxu0 }
 0x219   :  { %v2659_v42 = vpack.c.bf16 %v171_v40, %v171_v40  ;;  %180 = vrot.lane.b32.xlu0 %v2657_v39, %s2536_s2 }
 0x21b   :  { %182 = vrot.lane.b32.xlu1 %v2659_v42, %s2536_s2 }
 0x21f   :  { %184 = vrot.lane.b32.xlu1 %v2657_v39, %s2537_s26 }
 0x223   :  { %233 = vrot.lane.b32.xlu1 %v2659_v42, %s2537_s26 }
 0x28b   :  { %v181_v43 = vpop.permute.xlu0 %180 }
 0x28c   :  { %v2669_v44 = vcombine.low %v181_v43, %v181_v43 }
 0x28d   :  { %v183_v45 = vpop.permute.xlu1 %182 }
 0x28e   :  { %v2671_v46 = vcombine.low %v183_v45, %v183_v45  ;;  %283 = vrot.lane.b32.xlu0 %v2669_v44, %s2537_s26 }
 0x290   :  { %333 = vrot.lane.b32.xlu1 %v2671_v46, %s2537_s26 }
 0x291   :  { %v185_v47 = vpop.permute.xlu1 %184 }
 0x292   :  { %v191_v48 = vsel %vm186_vm2, %v185_v47, 0 }
 0x293   :  { %2251 = vmatpush3.bf16.xpose.msra.mxu1 %v191_v48 }
 0x294   :  { %2262 = vmatprep.subr.bf16.mxu1 %v2534_v15 }
 0x295   :  { %v234_v49 = vpop.permute.xlu1 %233 }
 0x296   :  { %v239_v50 = vsel %vm186_vm2, %v234_v49, 0 }
 0x297   :  { %2257 = vmatpush3.bf16.xpose.msra.mxu0 %v239_v50 }
 0x298   :  { %2268 = vmatprep.subr.bf16.mxu0 %v2534_v15 }
 0x29a   :  { %2253 = vmatmul.mubr.msk.bf16.vlgmr.msra.gmra.mrb[0].mxu1 %vm186_vm2, %v2657_v39 }
 0x29b   :  { %2264 = vmatprep.mubr.msk.bf16.mxu1 %vm2535_vm1, %v2534_v15 }
 0x29e   :  { %2259 = vmatmul.mubr.msk.bf16.vlgmr.msra.gmra.mrb[4].mxu0 %vm186_vm2, %v2659_v42 }
 0x29f   :  { %2270 = vmatprep.mubr.msk.bf16.mxu0 %vm2535_vm1, %v2534_v15 }
 0x300   :  { %v284_v51 = vpop.permute.xlu0 %283 }
 0x301   :  { %v289_v52 = vsel %vm186_vm2, %v284_v51, 0 }
 0x302   :  { %2263 = vmatpush3.bf16.xpose.msra.mxu1 %v289_v52  ;;  %v334_v53 = vpop.permute.xlu1 %333 }
 0x303   :  { %v339_v54 = vsel %vm186_vm2, %v334_v53, 0  ;;  %2274 = vmatprep.subr.bf16.mxu1 %v2534_v15 }
 0x304   :  { %2269 = vmatpush3.bf16.xpose.msra.mxu0 %v339_v54 }
 0x305   :  { %2280 = vmatprep.subr.bf16.mxu0 %v2534_v15 }
 0x309   :  { %2265 = vmatmul.mubr.msk.bf16.vlgmr.msra.gmra.mrb[4].mxu1 %vm186_vm2, %v181_v43 }
 0x30a   :  { %2276 = vmatprep.mubr.msk.bf16.mxu1 %vm2535_vm1, %v2534_v15 }
 0x30b   :  { %2271 = vmatmul.mubr.msk.bf16.vlgmr.msra.gmra.mrb[8].mxu0 %vm186_vm2, %v183_v45 }
 0x30c   :  { %2282 = vmatprep.mubr.msk.bf16.mxu0 %vm2535_vm1, %v2534_v15 }
 0x36d   :  { %v227_v55 = vpop.f32.mrb[0].mxu1 }
 0x36e   :  { %v381_v57 = vmul.f32 0.25, %v227_v55  ;;  %v2254_v58 = vpop.f32.mrb[1].mxu1 }
 0x36f   :  { %v230_v59 = vpop.f32.mrb[2].mxu1 }
 0x370   :  { %v2255_v60 = vpop.f32.mrb[3].mxu1  ;;  %v385_v61 = vadd.f32 %v2702_v56, %v381_v57 }
 0x371   :  { %v275_v62 = vpop.f32.mrb[4].mxu0 }
 0x372   :  { %v382_v0 = vmul.f32 0.25, %v275_v62  ;;  %v2260_v1 = vpop.f32.mrb[5].mxu0  ;;  %v390_v2 = vsel %vm389_vm3, %v385_v61, -inf }
 0x373   :  { %391 = vmax.xlane.f32.xlu0 %v390_v2  ;;  %v278_v3 = vpop.f32.mrb[6].mxu0 }
 0x374   :  { %v2261_v4 = vpop.f32.mrb[7].mxu0  ;;  %v386_v5 = vadd.f32 %v2708_v63, %v382_v0 }
 0x376   :  { %v393_v6 = vsel %vm389_vm3, %v386_v5, -inf }
 0x377   :  { %394 = vmax.xlane.f32.xlu1 %v393_v6  ;;  %v2446_v6 = vld [vmem:[%s3061_s4] sm:$0xff]  }
 0x3dc   :  { %v325_v7 = vpop.f32.mrb[4].mxu1 }
 0x3dd   :  { %v383_v8 = vmul.f32 0.25, %v325_v7  ;;  %v2266_v9 = vpop.f32.mrb[5].mxu1  ;;  %v2447_v7 = vld [vmem:[%s3061_s4 + $0x8] sm:$0xff]  }
 0x3de   :  { %v328_v10 = vpop.f32.mrb[6].mxu1  ;;  %v375_v11 = vpop.f32.mrb[8].mxu0 }
 0x3df   :  { %v384_v12 = vmul.f32 0.25, %v375_v11  ;;  %v2267_v13 = vpop.f32.mrb[7].mxu1  ;;  %v2272_v14 = vpop.f32.mrb[9].mxu0  ;;  %v387_v16 = vadd.f32 %v2702_v56, %v383_v8 }
 0x3e0   :  { %v378_v17 = vpop.f32.mrb[10].mxu0 }
 0x3e1   :  { %v2273_v18 = vpop.f32.mrb[11].mxu0  ;;  %v396_v19 = vsel %vm389_vm3, %v387_v16, -inf  ;;  %v388_v20 = vadd.f32 %v2708_v63, %v384_v12 }
 0x3e2   :  { %397 = vmax.xlane.f32.xlu0 %v396_v19 }
 0x3e3   :  { %v399_v21 = vsel %vm389_vm3, %v388_v20, -inf }
 0x3e6   :  { %400 = vmax.xlane.f32.xlu0 %v399_v21 }
 0x400   :  { %v392_v22 = vpop.xlane.xlu0 %391 }
 0x401   :  { %v402_v23 = vsub.f32 %v385_v61, %v392_v22 }
 0x403   :  { %v406_v24 = vmul.f32 1.442695, %v402_v23 }
 0x404   :  { %v395_v25 = vpop.xlane.xlu1 %394 }
 0x405   :  { %2474 = vpow2.f32 %v406_v24  ;;  %v403_v26 = vsub.f32 %v386_v5, %v395_v25 }
 0x407   :  { %v408_v27 = vmul.f32 1.442695, %v403_v26 }
 0x409   :  { %2476 = vpow2.f32 %v408_v27  ;;  %v695_v27 = vlaneseq }
 0x40f   :  { %v2475_v28 = vpop.eup %2474 }
 0x410   :  { %v414_v29 = vsel %vm389_vm3, %v2475_v28, 0.0 }
 0x411   :  { %415 = vadd.xlane.f32.xlu0 %v414_v29 }
 0x413   :  { %v2477_v30 = vpop.eup %2476 }
 0x414   :  { %v417_v33 = vsel %vm389_vm3, %v2477_v30, 0.0 }
 0x415   :  { %418 = vadd.xlane.f32.xlu1 %v417_v33 }
 0x426   :  { %487 = vrot.lane.b32.xlu1 %v2659_v42, %s2538_s1 }
 0x42a   :  { %535 = vrot.lane.b32.xlu1 %v2669_v44, %s2538_s1 }
 0x46f   :  { %v398_v34 = vpop.xlane.xlu0 %397 }
 0x470   :  { %v404_v35 = vsub.f32 %v387_v16, %v398_v34 }
 0x472   :  { %v410_v36 = vmul.f32 1.442695, %v404_v35  ;;  %v2769_v35 = vld [vmem:[%s3062_s8] sm:$0x3f] }
 0x473   :  { %v401_v37 = vpop.xlane.xlu0 %400 }
 0x474   :  { %2478 = vpow2.f32 %v410_v36  ;;  %v405_v38 = vsub.f32 %v388_v20, %v401_v37 }
 0x476   :  { %v412_v40 = vmul.f32 1.442695, %v405_v38 }
 0x478   :  { %2480 = vpow2.f32 %v412_v40 }
 0x47e   :  { %v2479_v41 = vpop.eup %2478 }
 0x47f   :  { %v420_v43 = vsel %vm389_vm3, %v2479_v41, 0.0 }
 0x480   :  { %421 = vadd.xlane.f32.xlu0 %v420_v43 }
 0x482   :  { %v2481_v45 = vpop.eup %2480 }
 0x483   :  { %v423_v47 = vsel %vm389_vm3, %v2481_v45, 0.0 }
 0x484   :  { %424 = vadd.xlane.f32.xlu1 %v423_v47 }
 0x495   :  { %583 = vrot.lane.b32.xlu1 %v2671_v46, %s2538_s1 }
 0x496   :  { %438 = vrot.lane.b32.xlu0 %v2657_v39, %s2538_s1 }
 0x49e   :  { %v416_v46 = vpop.xlane.xlu0 %415 }
 0x4a2   :  { %v419_v42 = vpop.xlane.xlu1 %418 }
 0x4a3   :  { %2482 = vrcp.f32 %v419_v42 }
 0x4a4   :  { %2484 = vrcp.f32 %v416_v46 }
 0x4a6   :  { %v488_v44 = vpop.permute.xlu1 %487 }
 0x4a7   :  { %v493_v48 = vsel %vm443_vm4, %v488_v44, 0 }
 0x4a8   :  { %2281 = vmatpush3.bf16.msra.mxu0 %v493_v48 }
 0x4a9   :  { %2292 = vmatprep.subr.bf16.mxu0 %v2534_v15 }
 0x4aa   :  { %v536_v52 = vpop.permute.xlu1 %535 }
 0x4ab   :  { %v541_v61 = vsel %vm443_vm4, %v536_v52, 0 }
 0x4ad   :  { %v2483_v49 = vpop.eup %2482 }
 0x4ae   :  { %v431_v50 = vmul.f32 %v2483_v49, %v2477_v30  ;;  %v2485_v39 = vpop.eup %2484 }
 0x4af   :  { %v430_v54 = vmul.f32 %v2485_v39, %v2475_v28  ;;  %v2763_v28 = vshrl.u32 %v695_v27, 7 }
 0x4b0   :  { %v435_v51 = vpack.c.bf16 %v431_v50, %v431_v50 }
 0x4b1   :  { %v434_v59 = vpack.c.bf16 %v430_v54, %v430_v54  ;;  %v697_v33 = vsub.s32 0, %v2763_v28 }
 0x4b2   :  { %2283 = vmatmul.mubr.msk.bf16.vlgmr.msra.gmra.mrb[12].mxu0 %vm389_vm3, %v435_v51 }
 0x4b3   :  { %2294 = vmatprep.mubr.msk.bf16.mxu0 %vm2535_vm1, %v2534_v15  ;;  %v698_v37 = vrot.slane %v2769_v35, %v697_v33 }
 0x50d   :  { %v422_v53 = vpop.xlane.xlu0 %421 }
 0x50e   :  { %2486 = vrcp.f32 %v422_v53 }
 0x511   :  { %v425_v55 = vpop.xlane.xlu1 %424  ;;  %v439_v57 = vpop.permute.xlu0 %438 }
 0x512   :  { %2488 = vrcp.f32 %v425_v55  ;;  %v445_v58 = vsel %vm443_vm4, %v439_v57, 0 }
 0x513   :  { %2275 = vmatpush3.bf16.msra.mxu1 %v445_v58 }
 0x514   :  { %2286 = vmatprep.subr.bf16.mxu1 %v2534_v15 }
 0x515   :  { %v584_v60 = vpop.permute.xlu1 %583 }
 0x516   :  { %v589_v62 = vsel %vm443_vm4, %v584_v60, 0  ;;  %2277 = vmatmul.mubr.msk.bf16.vlgmr.msra.gmra.mrb[8].mxu1 %vm389_vm3, %v434_v59  ;;  %v2449_v60 = vld [vmem:[%s3063_s5 + $0x8] sm:$0xff]  }
 0x517   :  { %2287 = vmatpush3.bf16.msra.mxu1 %v541_v61  ;;  %2293 = vmatpush3.bf16.msra.mxu0 %v589_v62 }
 0x518   :  { %v2487_v0 = vpop.eup %2486  ;;  %2288 = vmatprep.mubr.msk.bf16.mxu1 %vm2535_vm1, %v2534_v15  ;;  %2298 = vmatprep.subr.bf16.mxu1 %v2534_v15 }
 0x519   :  { %v432_v1 = vmul.f32 %v2487_v0, %v2479_v41  ;;  %2304 = vmatprep.subr.bf16.mxu0 %v2534_v15 }
 0x51b   :  { %v436_v2 = vpack.c.bf16 %v432_v1, %v432_v1 }
 0x51c   :  { %v2489_v3 = vpop.eup %2488 }
 0x51d   :  { %v433_v4 = vmul.f32 %v2489_v3, %v2481_v45 }
 0x51e   :  { %2289 = vmatmul.mubr.msk.bf16.vlgmr.msra.gmra.mrb[12].mxu1 %vm389_vm3, %v436_v2 }
 0x51f   :  { %v437_v5 = vpack.c.bf16 %v433_v4, %v433_v4  ;;  %2300 = vmatprep.mubr.msk.bf16.mxu1 %vm2535_vm1, %v2534_v15  ;;  %2299 = vmatpush3.bf16.msra.mxu1 %v2446_v6  ;;  %v784_v4 = vsub.s32 2, %v2763_v28 }
 0x520   :  { %2310 = vmatprep.subr.bf16.mxu1 %v2534_v15 }
 0x521   :  { %2295 = vmatmul.mubr.msk.bf16.vlgmr.msra.gmra.mrb[16].mxu0 %vm389_vm3, %v437_v5  ;;  %v785_v6 = vrot.slane %v2769_v35, %v784_v4 }
 0x522   :  { %2306 = vmatprep.mubr.msk.bf16.mxu0 %vm2535_vm1, %v2534_v15  ;;  %2305 = vmatpush3.bf16.msra.mxu0 %v2447_v7 }
 0x523   :  { %2318 = vmatprep.subr.bf16.mxu0 %v2534_v15 }
 0x585   :  { %v529_v8 = vpop.f32.mrb[12].mxu0 }
 0x586   :  { %v2284_v9 = vpop.f32.mrb[13].mxu0 }
 0x587   :  { %v532_v10 = vpop.f32.mrb[14].mxu0 }
 0x588   :  { %v2285_v11 = vpop.f32.mrb[15].mxu0 }
 0x5e9   :  { %v481_v12 = vpop.f32.mrb[8].mxu1 }
 0x5ea   :  { %v644_v13 = vpack.c.bf16 %v529_v8, %v481_v12  ;;  %v2278_v14 = vpop.f32.mrb[9].mxu1  ;;  %v790_v8 = vsub.s32 3, %v2763_v28 }
 0x5eb   :  { %v484_v16 = vpop.f32.mrb[10].mxu1 }
 0x5ec   :  { %v2279_v17 = vpop.f32.mrb[11].mxu1  ;;  %2301 = vmatmul.mubr.msk.bf16.vlgmr.msra.gmra.mrb[16].mxu1 %vm186_vm2, %v644_v13  ;;  %v791_v12 = vrot.slane %v2769_v35, %v790_v8 }
 0x5ed   :  { %2314 = vmatprep.mubr.msk.bf16.mxu1 %vm2535_vm1, %v2534_v15 }
 0x5f1   :  { %v577_v18 = vpop.f32.mrb[12].mxu1 }
 0x5f2   :  { %v2290_v19 = vpop.f32.mrb[13].mxu1 }
 0x5f3   :  { %v580_v20 = vpop.f32.mrb[14].mxu1  ;;  %v2451_v19 = vld [vmem:[%s3061_s4 + $0x18] sm:$0xff]  }
 0x5f4   :  { %v2291_v21 = vpop.f32.mrb[15].mxu1  ;;  %v625_v22 = vpop.f32.mrb[16].mxu0  ;;  %v2452_v20 = vld [vmem:[%s3061_s4 + $0x20] sm:$0xff]  }
 0x5f5   :  { %v701_v23 = vpack.c.bf16 %v625_v22, %v577_v18  ;;  %v2296_v24 = vpop.f32.mrb[17].mxu0  ;;  %v2450_v18 = vld [vmem:[%s3061_s4 + $0x10] sm:$0xff]   ;;  %v2453_v21 = vld [vmem:[%s3061_s4 + $0x28] sm:$0xff]   ;;  %v2097_v22 = vld [vmem:[%s3064_s7] ss:$0 sm:$0xff] }
 0x5f6   :  { %v628_v25 = vpop.f32.mrb[18].mxu0 }
 0x5f7   :  { %v2297_v26 = vpop.f32.mrb[19].mxu0  ;;  %2307 = vmatmul.mubr.msk.bf16.vlgmr.msra.gmra.mrb[20].mxu0 %vm186_vm2, %v701_v23 }
 0x5f8   :  { %2326 = vmatprep.mubr.msk.bf16.mxu0 %vm2535_vm1, %v2534_v15  ;;  %2319 = vmatpush3.bf16.msra.mxu0 %v2450_v18 }
 0x5f9   :  { %2320 = vmatprep.subr.bf16.mxu0 %v2534_v15 }
 0x5fc   :  { %2321 = vmatpush3.bf16.msra.mxu0 %v2451_v19 }
 0x5fd   :  { %2322 = vmatprep.subr.bf16.mxu0 %v2534_v15 }
 0x600   :  { %2323 = vmatpush3.bf16.msra.mxu0 %v2452_v20 }
 0x601   :  { %2324 = vmatprep.subr.bf16.mxu0 %v2534_v15 }
 0x604   :  { %2325 = vmatpush3.bf16.msra.mxu0 %v2453_v21 }
 0x605   :  { %2344 = vmatprep.subr.bf16.mxu0 %v2534_v15 }
 0x6bf   :  { %v688_v29 = vpop.f32.mrb[16].mxu1 }
 0x6c0   :  { %v2302_v30 = vpop.f32.mrb[17].mxu1  ;;  %v699_v38 = vadd.f32 %v698_v37, %v688_v29 }
 0x6c1   :  { %v691_v34 = vpop.f32.mrb[18].mxu1 }
 0x6c2   :  { %v2303_v36 = vpop.f32.mrb[19].mxu1  ;;  %v700_v41 = vadd.f32 %v698_v37, %v691_v34 }
 0x6ca   :  { %v745_v40 = vpop.f32.mrb[20].mxu0 }
 0x6cb   :  { %v752_v43 = vadd.f32 %v745_v40, %v699_v38  ;;  %v2308_v45 = vpop.f32.mrb[21].mxu0 }
 0x6cc   :  { %v748_v47 = vpop.f32.mrb[22].mxu0 }
 0x6cd   :  { %v753_v42 = vadd.f32 %v748_v47, %v700_v41  ;;  %v2309_v44 = vpop.f32.mrb[23].mxu0  ;;  %v754_v48 = vadd.f32 %v752_v43, %v2645_v31 }
 0x6cf   :  { %v756_v49 = vsel %vm52_vm0, %v754_v48, 0.0  ;;  %v755_v50 = vadd.f32 %v753_v42, %v2647_v32  ;;  %v2448_v32 = vld [vmem:[%s3063_s5] sm:$0xff]  }
 0x6d0   :  { %757 = vadd.xlane.f32.xlu0 %v756_v49  ;;  %2311 = vmatpush3.bf16.msra.mxu1 %v2448_v32 }
 0x6d1   :  { %v759_v51 = vsel %vm52_vm0, %v755_v50, 0.0  ;;  %2312 = vmatprep.subr.bf16.mxu1 %v2534_v15 }
 0x6d2   :  { %760 = vadd.xlane.f32.xlu1 %v759_v51 }
 0x6d4   :  { %2313 = vmatpush3.bf16.msra.mxu1 %v2449_v60 }
 0x6d5   :  { %2330 = vmatprep.subr.bf16.mxu1 %v2534_v15 }
 0x75d   :  { %v758_v46 = vpop.xlane.xlu0 %757 }
 0x75e   :  { %v762_v39 = vmul.f32 0.03125, %v758_v46 }
 0x75f   :  { %v761_v52 = vpop.xlane.xlu1 %760 }
 0x760   :  { %v764_v53 = vsub.f32 %v754_v48, %v762_v39  ;;  %v763_v54 = vmul.f32 0.03125, %v761_v52 }
 0x762   :  { %v765_v55 = vsub.f32 %v755_v50, %v763_v54  ;;  %v766_v57 = vmul.f32 %v764_v53, %v764_v53 }
 0x764   :  { %v768_v58 = vsel %vm52_vm0, %v766_v57, 0.0  ;;  %v767_v59 = vmul.f32 %v765_v55, %v765_v55 }
 0x765   :  { %769 = vadd.xlane.f32.xlu0 %v768_v58 }
 0x766   :  { %v771_v31 = vsel %vm52_vm0, %v767_v59, 0.0 }
 0x769   :  { %772 = vadd.xlane.f32.xlu0 %v771_v31 }
 0x7f2   :  { %v770_v61 = vpop.xlane.xlu0 %769 }
 0x7f3   :  { %v774_v62 = vmul.f32 0.03125, %v770_v61 }
 0x7f5   :  { %v776_v0 = vadd.f32 1e-12, %v774_v62 }
 0x7f6   :  { %v773_v1 = vpop.xlane.xlu0 %772 }
 0x7f7   :  { %2490 = vrsqrt.f32 %v776_v0  ;;  %v775_v2 = vmul.f32 0.03125, %v773_v1 }
 0x7f9   :  { %v777_v3 = vadd.f32 1e-12, %v775_v2 }
 0x7fb   :  { %2492 = vrsqrt.f32 %v777_v3 }
 0x801   :  { %v2491_v5 = vpop.eup %2490 }
 0x802   :  { %v780_v7 = vmul.f32 %v2491_v5, %v764_v53  ;;  %v883_v53 = vsub.s32 1, %v2763_v28 }
 0x804   :  { %v786_v10 = vmul.f32 %v785_v6, %v780_v7  ;;  %v884_v54 = vrot.slane %v2769_v35, %v883_v53 }
 0x805   :  { %v2493_v9 = vpop.eup %2492 }
 0x806   :  { %v781_v11 = vmul.f32 %v2493_v9, %v765_v55  ;;  %v792_v14 = vadd.f32 %v791_v12, %v786_v10 }
 0x808   :  { %v787_v13 = vmul.f32 %v785_v6, %v781_v11 }
 0x80a   :  { %v793_v16 = vadd.f32 %v791_v12, %v787_v13  ;;  %v2454_v13 = vld [vmem:[%s3057_s3 + $0x10] sm:$0xff]  }
 0x80c   :  { %v794_v17 = vpack.c.bf16 %v793_v16, %v792_v14 }
 0x80e   :  { %2315 = vmatmul.mubr.msk.bf16.vlgmr.msra.gmra.mrb[20].mxu1 %vm52_vm0, %v794_v17 }
 0x80f   :  { %2334 = vmatprep.mubr.msk.bf16.mxu1 %vm2535_vm1, %v2534_v15  ;;  %2331 = vmatpush3.bf16.msra.mxu1 %v2454_v13 }
 0x810   :  { %2332 = vmatprep.subr.bf16.mxu1 %v2534_v15 }
 0x8e1   :  { %v855_v23 = vpop.f32.mrb[20].mxu1 }
 0x8e2   :  { %v856_v24 = vadd.f32 %v2097_v22, %v855_v23  ;;  %v2316_v25 = vpop.f32.mrb[21].mxu1 }
 0x8e3   :  { %v858_v26 = vpop.f32.mrb[22].mxu1 }
 0x8e4   :  { %v864_v27 = vmul.f32 0.044715, %v856_v24  ;;  %v859_v29 = vadd.f32 %v2097_v22, %v858_v26  ;;  %v2317_v30 = vpop.f32.mrb[23].mxu1  ;;  %v862_v49 = vmul.f32 0.5, %v856_v24  ;;  %v984_v22 = vsub.s32 4, %v2763_v28 }
 0x8e6   :  { %v866_v34 = vmul.f32 %v864_v27, %v856_v24  ;;  %v865_v36 = vmul.f32 0.044715, %v859_v29  ;;  %v863_v50 = vmul.f32 0.5, %v859_v29  ;;  %v985_v23 = vrot.slane %v2769_v35, %v984_v22 }
 0x8e8   :  { %v868_v37 = vmul.f32 %v866_v34, %v856_v24  ;;  %v867_v38 = vmul.f32 %v865_v36, %v859_v29 }
 0x8ea   :  { %v870_v40 = vadd.f32 %v868_v37, %v856_v24  ;;  %v869_v41 = vmul.f32 %v867_v38, %v859_v29  ;;  %v990_v24 = vsub.s32 5, %v2763_v28  ;;  %v2466_v28 = vld [vmem:[%s3066_s11] sm:$0xff]  }
 0x8ec   :  { %v872_v43 = vmul.f32 0.7978846, %v870_v40  ;;  %v871_v45 = vadd.f32 %v869_v41, %v859_v29  ;;  %v991_v34 = vrot.slane %v2769_v35, %v990_v24  ;;  %v2111_v41 = vld [vmem:[%s3059_s6 + $0x1] ss:$0 sm:$0xff] }
 0x8ee   :  { %2494 = vtanh.f32 %v872_v43  ;;  %v873_v47 = vmul.f32 0.7978846, %v871_v45 }
 0x8f0   :  { %2496 = vtanh.f32 %v873_v47 }
 0x8f8   :  { %v2495_v42 = vpop.eup %2494 }
 0x8f9   :  { %v876_v44 = vadd.f32 1.0, %v2495_v42 }
 0x8fa   :  { %v2497_v48 = vpop.eup %2496 }
 0x8fb   :  { %v877_v51 = vadd.f32 1.0, %v2497_v48  ;;  %v878_v46 = vmul.f32 %v876_v44, %v862_v49 }
 0x8fd   :  { %v879_v39 = vmul.f32 %v877_v51, %v863_v50 }
 0x8ff   :  { %v880_v52 = vpack.c.bf16 %v879_v39, %v878_v46 }
 0x901   :  { %2327 = vmatmul.mubr.msk.bf16.vlgmr.msra.gmra.mrb[24].mxu0 %vm909_vm5, %v880_v52 }
 0x902   :  { %2346 = vmatprep.mubr.msk.bf16.mxu0 %vm2535_vm1, %v2534_v15 }
 0x9d4   :  { %v947_v55 = vpop.f32.mrb[24].mxu0 }
 0x9d5   :  { %v948_v57 = vadd.f32 %v947_v55, %v884_v54  ;;  %v2328_v58 = vpop.f32.mrb[25].mxu0 }
 0x9d6   :  { %v950_v59 = vpop.f32.mrb[26].mxu0 }
 0x9d7   :  { %v951_v31 = vadd.f32 %v950_v59, %v884_v54  ;;  %v2329_v32 = vpop.f32.mrb[27].mxu0  ;;  %v954_v60 = vadd.f32 %v948_v57, %v792_v14  ;;  %v2455_v14 = vld [vmem:[%s3057_s3 + $0x18] sm:$0xff]  }
 0x9d8   :  { %2333 = vmatpush3.bf16.msra.mxu1 %v2455_v14 }
 0x9d9   :  { %v956_v61 = vsel %vm52_vm0, %v954_v60, 0.0  ;;  %v955_v62 = vadd.f32 %v951_v31, %v793_v16  ;;  %2338 = vmatprep.subr.bf16.mxu1 %v2534_v15 }
 0x9da   :  { %957 = vadd.xlane.f32.xlu0 %v956_v61 }
 0x9db   :  { %v959_v0 = vsel %vm52_vm0, %v955_v62, 0.0 }
 0x9dc   :  { %960 = vadd.xlane.f32.xlu1 %v959_v0 }
 0xa67   :  { %v958_v1 = vpop.xlane.xlu0 %957 }
 0xa68   :  { %v962_v2 = vmul.f32 0.03125, %v958_v1 }
 0xa69   :  { %v961_v3 = vpop.xlane.xlu1 %960 }
 0xa6a   :  { %v964_v5 = vsub.f32 %v954_v60, %v962_v2  ;;  %v963_v6 = vmul.f32 0.03125, %v961_v3 }
 0xa6c   :  { %v965_v7 = vsub.f32 %v955_v62, %v963_v6  ;;  %v966_v9 = vmul.f32 %v964_v5, %v964_v5 }
 0xa6e   :  { %v968_v10 = vsel %vm52_vm0, %v966_v9, 0.0  ;;  %v967_v11 = vmul.f32 %v965_v7, %v965_v7 }
 0xa6f   :  { %969 = vadd.xlane.f32.xlu0 %v968_v10 }
 0xa70   :  { %v971_v12 = vsel %vm52_vm0, %v967_v11, 0.0 }
 0xa71   :  { %972 = vadd.xlane.f32.xlu1 %v971_v12 }
 0xafc   :  { %v970_v16 = vpop.xlane.xlu0 %969 }
 0xafd   :  { %v974_v17 = vmul.f32 0.03125, %v970_v16 }
 0xafe   :  { %v973_v18 = vpop.xlane.xlu1 %972 }
 0xaff   :  { %v976_v19 = vadd.f32 1e-12, %v974_v17  ;;  %v975_v20 = vmul.f32 0.03125, %v973_v18 }
 0xb01   :  { %2498 = vrsqrt.f32 %v976_v19  ;;  %v977_v21 = vadd.f32 1e-12, %v975_v20 }
 0xb03   :  { %2500 = vrsqrt.f32 %v977_v21 }
 0xb0b   :  { %v2499_v25 = vpop.eup %2498 }
 0xb0c   :  { %v980_v26 = vmul.f32 %v2499_v25, %v964_v5 }
 0xb0d   :  { %v2501_v27 = vpop.eup %2500 }
 0xb0e   :  { %v986_v29 = vmul.f32 %v985_v23, %v980_v26  ;;  %v981_v30 = vmul.f32 %v2501_v27, %v965_v7 }
 0xb10   :  { %v987_v36 = vmul.f32 %v985_v23, %v981_v30  ;;  %v2845_v37 = vadd.f32 %v991_v34, %v986_v29 }
 0xb12   :  { %v2847_v38 = vadd.f32 %v991_v34, %v987_v36 }
 0xb14   :  { %v994_v40 = vpack.c.bf16 %v2847_v38, %v2845_v37 }
 0xb16   :  { %2335 = vmatmul.mubr.msk.bf16.vlgmr.msra.gmra.mrb[24].mxu1 %vm52_vm0, %v994_v40 }
 0xb17   :  { %2340 = vmatprep.mubr.msk.bf16.mxu1 %vm2535_vm1, %v2534_v15 }
 0xbe9   :  { %v1057_v43 = vpop.f32.mrb[24].mxu1 }
 0xbea   :  { %v1058_v45 = vadd.f32 %v2111_v41, %v1057_v43  ;;  %v2336_v35 = vpop.f32.mrb[25].mxu1 }
 0xbeb   :  { %v1060_v47 = vpop.f32.mrb[26].mxu1 }
 0xbec   :  { %v2857_v42 = vpack.c.bf16 %v1058_v45, %v1058_v45  ;;  %v1061_v44 = vadd.f32 %v2111_v41, %v1060_v47  ;;  %v2337_v48 = vpop.f32.mrb[27].mxu1 }
 0xbee   :  { %v2859_v49 = vpack.c.bf16 %v1061_v44, %v1061_v44  ;;  %1070 = vrot.lane.b32.xlu0 %v2857_v42, %s2536_s2 }
 0xbf0   :  { %1072 = vrot.lane.b32.xlu1 %v2859_v49, %s2536_s2 }
 0xbf4   :  { %1074 = vrot.lane.b32.xlu1 %v2857_v42, %s2537_s26 }
 0xbf8   :  { %1122 = vrot.lane.b32.xlu1 %v2859_v49, %s2537_s26 }
 0xc60   :  { %v1071_v50 = vpop.permute.xlu0 %1070 }
 0xc61   :  { %v2869_v51 = vcombine.low %v1071_v50, %v1071_v50 }
 0xc62   :  { %v1073_v46 = vpop.permute.xlu1 %1072 }
 0xc63   :  { %v2871_v39 = vcombine.low %v1073_v46, %v1073_v46  ;;  %1172 = vrot.lane.b32.xlu0 %v2869_v51, %s2537_s26 }
 0xc65   :  { %1222 = vrot.lane.b32.xlu1 %v2871_v39, %s2537_s26 }
 0xc66   :  { %v1075_v52 = vpop.permute.xlu1 %1074 }
 0xc67   :  { %v1080_v54 = vsel %vm186_vm2, %v1075_v52, 0 }
 0xc68   :  { %2339 = vmatpush3.bf16.xpose.msra.mxu1 %v1080_v54 }
 0xc69   :  { %2350 = vmatprep.subr.bf16.mxu1 %v2534_v15 }
 0xc6a   :  { %v1123_v55 = vpop.permute.xlu1 %1122 }
 0xc6b   :  { %v1128_v57 = vsel %vm186_vm2, %v1123_v55, 0 }
 0xc6c   :  { %2345 = vmatpush3.bf16.xpose.msra.mxu0 %v1128_v57 }
 0xc6d   :  { %2356 = vmatprep.subr.bf16.mxu0 %v2534_v15 }
 0xc6f   :  { %2341 = vmatmul.mubr.msk.bf16.vlgmr.msra.gmra.mrb[28].mxu1 %vm186_vm2, %v2857_v42 }
 0xc70   :  { %2352 = vmatprep.mubr.msk.bf16.mxu1 %vm2535_vm1, %v2534_v15 }
 0xc73   :  { %2347 = vmatmul.mubr.msk.bf16.vlgmr.msra.gmra.mrb[28].mxu0 %vm186_vm2, %v2859_v49 }
 0xc74   :  { %2358 = vmatprep.mubr.msk.bf16.mxu0 %vm2535_vm1, %v2534_v15 }
 0xcd5   :  { %v1173_v58 = vpop.permute.xlu0 %1172 }
 0xcd6   :  { %v1178_v59 = vsel %vm186_vm2, %v1173_v58, 0 }
 0xcd7   :  { %2351 = vmatpush3.bf16.xpose.msra.mxu1 %v1178_v59  ;;  %v1223_v31 = vpop.permute.xlu1 %1222 }
 0xcd8   :  { %v1228_v32 = vsel %vm186_vm2, %v1223_v31, 0  ;;  %2362 = vmatprep.subr.bf16.mxu1 %v2534_v15 }
 0xcd9   :  { %2357 = vmatpush3.bf16.xpose.msra.mxu0 %v1228_v32 }
 0xcda   :  { %2368 = vmatprep.subr.bf16.mxu0 %v2534_v15 }
 0xcde   :  { %2353 = vmatmul.mubr.msk.bf16.vlgmr.msra.gmra.mrb[32].mxu1 %vm186_vm2, %v1071_v50 }
 0xcdf   :  { %2364 = vmatprep.mubr.msk.bf16.mxu1 %vm2535_vm1, %v2534_v15 }
 0xce0   :  { %2359 = vmatmul.mubr.msk.bf16.vlgmr.msra.gmra.mrb[32].mxu0 %vm186_vm2, %v1073_v46 }
 0xce1   :  { %2370 = vmatprep.mubr.msk.bf16.mxu0 %vm2535_vm1, %v2534_v15 }
 0xd42   :  { %v1116_v60 = vpop.f32.mrb[28].mxu1 }
 0xd43   :  { %v1270_v61 = vmul.f32 0.25, %v1116_v60  ;;  %v2342_v62 = vpop.f32.mrb[29].mxu1 }
 0xd44   :  { %v1119_v0 = vpop.f32.mrb[30].mxu1 }
 0xd45   :  { %v2343_v1 = vpop.f32.mrb[31].mxu1  ;;  %v1274_v2 = vadd.f32 %v2702_v56, %v1270_v61 }
 0xd46   :  { %v1164_v3 = vpop.f32.mrb[28].mxu0 }
 0xd47   :  { %v1271_v5 = vmul.f32 0.25, %v1164_v3  ;;  %v2348_v6 = vpop.f32.mrb[29].mxu0  ;;  %v1278_v7 = vsel %vm389_vm3, %v1274_v2, -inf }
 0xd48   :  { %1279 = vmax.xlane.f32.xlu0 %v1278_v7  ;;  %v1167_v9 = vpop.f32.mrb[30].mxu0 }
 0xd49   :  { %v2349_v10 = vpop.f32.mrb[31].mxu0  ;;  %v1275_v11 = vadd.f32 %v2708_v63, %v1271_v5 }
 0xd4b   :  { %v1281_v12 = vsel %vm389_vm3, %v1275_v11, -inf }
 0xd4c   :  { %1282 = vmax.xlane.f32.xlu1 %v1281_v12 }
 0xdb1   :  { %v1214_v13 = vpop.f32.mrb[32].mxu1 }
 0xdb2   :  { %v1272_v14 = vmul.f32 0.25, %v1214_v13  ;;  %v2354_v16 = vpop.f32.mrb[33].mxu1 }
 0xdb3   :  { %v1217_v17 = vpop.f32.mrb[34].mxu1  ;;  %v1264_v18 = vpop.f32.mrb[32].mxu0 }
 0xdb4   :  { %v1273_v19 = vmul.f32 0.25, %v1264_v18  ;;  %v2355_v20 = vpop.f32.mrb[35].mxu1  ;;  %v2360_v21 = vpop.f32.mrb[33].mxu0  ;;  %v1276_v23 = vadd.f32 %v2702_v56, %v1272_v14  ;;  %v2456_v18 = vld [vmem:[%s3061_s4 + $0x30] sm:$0xff]  }
 0xdb5   :  { %v1267_v25 = vpop.f32.mrb[34].mxu0 }
 0xdb6   :  { %v2361_v26 = vpop.f32.mrb[35].mxu0  ;;  %v1284_v27 = vsel %vm389_vm3, %v1276_v23, -inf  ;;  %v1277_v29 = vadd.f32 %v2708_v63, %v1273_v19  ;;  %v2457_v19 = vld [vmem:[%s3061_s4 + $0x38] sm:$0xff]  }
 0xdb7   :  { %1285 = vmax.xlane.f32.xlu0 %v1284_v27 }
 0xdb8   :  { %v1287_v30 = vsel %vm389_vm3, %v1277_v29, -inf }
 0xdbb   :  { %1288 = vmax.xlane.f32.xlu0 %v1287_v30 }
 0xdd5   :  { %v1280_v34 = vpop.xlane.xlu0 %1279 }
 0xdd6   :  { %v1290_v36 = vsub.f32 %v1274_v2, %v1280_v34 }
 0xdd8   :  { %v1294_v40 = vmul.f32 1.442695, %v1290_v36 }
 0xdd9   :  { %v1283_v41 = vpop.xlane.xlu1 %1282 }
 0xdda   :  { %2502 = vpow2.f32 %v1294_v40  ;;  %v1291_v43 = vsub.f32 %v1275_v11, %v1283_v41 }
 0xddc   :  { %v1296_v45 = vmul.f32 1.442695, %v1291_v43 }
 0xdde   :  { %2504 = vpow2.f32 %v1296_v45 }
 0xde4   :  { %v2503_v35 = vpop.eup %2502 }
 0xde5   :  { %v1302_v56 = vsel %vm389_vm3, %v2503_v35, 0.0 }
 0xde6   :  { %1303 = vadd.xlane.f32.xlu0 %v1302_v56 }
 0xde8   :  { %v2505_v47 = vpop.eup %2504 }
 0xde9   :  { %v1305_v44 = vsel %vm389_vm3, %v2505_v47, 0.0 }
 0xdea   :  { %1306 = vadd.xlane.f32.xlu1 %v1305_v44 }
 0xdfb   :  { %1374 = vrot.lane.b32.xlu1 %v2859_v49, %s2538_s1 }
 0xdff   :  { %1422 = vrot.lane.b32.xlu1 %v2869_v51, %s2538_s1 }
 0xe44   :  { %v1286_v63 = vpop.xlane.xlu0 %1285 }
 0xe45   :  { %v1292_v48 = vsub.f32 %v1276_v23, %v1286_v63 }
 0xe47   :  { %v1298_v50 = vmul.f32 1.442695, %v1292_v48 }
 0xe48   :  { %v1289_v46 = vpop.xlane.xlu0 %1288 }
 0xe49   :  { %2506 = vpow2.f32 %v1298_v50  ;;  %v1293_v52 = vsub.f32 %v1277_v29, %v1289_v46  ;;  %v2956_v46 = vld [vmem:[%s3062_s8 + $0x8] sm:$0x3f] }
 0xe4b   :  { %v1300_v54 = vmul.f32 1.442695, %v1293_v52 }
 0xe4d   :  { %2508 = vpow2.f32 %v1300_v54  ;;  %v1587_v54 = vrot.slane %v2956_v46, %v697_v33 }
 0xe53   :  { %v2507_v55 = vpop.eup %2506 }
 0xe54   :  { %v1308_v57 = vsel %vm389_vm3, %v2507_v55, 0.0 }
 0xe55   :  { %1309 = vadd.xlane.f32.xlu0 %v1308_v57 }
 0xe57   :  { %v2509_v58 = vpop.eup %2508 }
 0xe58   :  { %v1311_v59 = vsel %vm389_vm3, %v2509_v58, 0.0 }
 0xe59   :  { %1312 = vadd.xlane.f32.xlu1 %v1311_v59 }
 0xe6a   :  { %1470 = vrot.lane.b32.xlu1 %v2871_v39, %s2538_s1 }
 0xe6b   :  { %1326 = vrot.lane.b32.xlu0 %v2857_v42, %s2538_s1 }
 0xe73   :  { %v1304_v39 = vpop.xlane.xlu0 %1303 }
 0xe77   :  { %v1307_v49 = vpop.xlane.xlu1 %1306 }
 0xe78   :  { %2510 = vrcp.f32 %v1307_v49 }
 0xe79   :  { %2512 = vrcp.f32 %v1304_v39 }
 0xe7b   :  { %v1375_v51 = vpop.permute.xlu1 %1374 }
 0xe7c   :  { %v1380_v31 = vsel %vm443_vm4, %v1375_v51, 0 }
 0xe7d   :  { %2369 = vmatpush3.bf16.msra.mxu0 %v1380_v31 }
 0xe7e   :  { %2380 = vmatprep.subr.bf16.mxu0 %v2534_v15 }
 0xe7f   :  { %v1423_v42 = vpop.permute.xlu1 %1422 }
 0xe80   :  { %v1428_v9 = vsel %vm443_vm4, %v1423_v42, 0 }
 0xe82   :  { %v2511_v32 = vpop.eup %2510 }
 0xe83   :  { %v1319_v60 = vmul.f32 %v2511_v32, %v2505_v47  ;;  %v2513_v62 = vpop.eup %2512 }
 0xe84   :  { %v1318_v1 = vmul.f32 %v2513_v62, %v2503_v35 }
 0xe85   :  { %v1323_v61 = vpack.c.bf16 %v1319_v60, %v1319_v60 }
 0xe86   :  { %v1322_v6 = vpack.c.bf16 %v1318_v1, %v1318_v1 }
 0xe87   :  { %2371 = vmatmul.mubr.msk.bf16.vlgmr.msra.gmra.mrb[36].mxu0 %vm389_vm3, %v1323_v61 }
 0xe88   :  { %2382 = vmatprep.mubr.msk.bf16.mxu0 %vm2535_vm1, %v2534_v15 }
 0xee2   :  { %v1310_v0 = vpop.xlane.xlu0 %1309 }
 0xee3   :  { %2514 = vrcp.f32 %v1310_v0 }
 0xee6   :  { %v1313_v2 = vpop.xlane.xlu1 %1312  ;;  %v1327_v3 = vpop.permute.xlu0 %1326 }
 0xee7   :  { %2516 = vrcp.f32 %v1313_v2  ;;  %v1332_v5 = vsel %vm443_vm4, %v1327_v3, 0 }
 0xee8   :  { %2363 = vmatpush3.bf16.msra.mxu1 %v1332_v5 }
 0xee9   :  { %2374 = vmatprep.subr.bf16.mxu1 %v2534_v15 }
 0xeea   :  { %v1471_v7 = vpop.permute.xlu1 %1470 }
 0xeeb   :  { %v1476_v10 = vsel %vm443_vm4, %v1471_v7, 0  ;;  %2365 = vmatmul.mubr.msk.bf16.vlgmr.msra.gmra.mrb[36].mxu1 %vm389_vm3, %v1322_v6 }
 0xeec   :  { %2375 = vmatpush3.bf16.msra.mxu1 %v1428_v9  ;;  %2381 = vmatpush3.bf16.msra.mxu0 %v1476_v10  ;;  %v2459_v9 = vld [vmem:[%s3063_s5 + $0x18] sm:$0xff]  }
 0xeed   :  { %v2515_v11 = vpop.eup %2514  ;;  %2376 = vmatprep.mubr.msk.bf16.mxu1 %vm2535_vm1, %v2534_v15  ;;  %2386 = vmatprep.subr.bf16.mxu1 %v2534_v15 }
 0xeee   :  { %v1320_v12 = vmul.f32 %v2515_v11, %v2507_v55  ;;  %2392 = vmatprep.subr.bf16.mxu0 %v2534_v15 }
 0xef0   :  { %v1324_v13 = vpack.c.bf16 %v1320_v12, %v1320_v12 }
 0xef1   :  { %v2517_v14 = vpop.eup %2516 }
 0xef2   :  { %v1321_v16 = vmul.f32 %v2517_v14, %v2509_v58 }
 0xef3   :  { %2377 = vmatmul.mubr.msk.bf16.vlgmr.msra.gmra.mrb[40].mxu1 %vm389_vm3, %v1324_v13 }
 0xef4   :  { %v1325_v17 = vpack.c.bf16 %v1321_v16, %v1321_v16  ;;  %2388 = vmatprep.mubr.msk.bf16.mxu1 %vm2535_vm1, %v2534_v15  ;;  %2387 = vmatpush3.bf16.msra.mxu1 %v2456_v18  ;;  %v1674_v18 = vrot.slane %v2956_v46, %v784_v4  ;;  %v2460_v4 = vld [vmem:[%s3061_s4 + $0x40] sm:$0xff]  }
 0xef5   :  { %2398 = vmatprep.subr.bf16.mxu1 %v2534_v15 }
 0xef6   :  { %2383 = vmatmul.mubr.msk.bf16.vlgmr.msra.gmra.mrb[40].mxu0 %vm389_vm3, %v1325_v17 }
 0xef7   :  { %2394 = vmatprep.mubr.msk.bf16.mxu0 %vm2535_vm1, %v2534_v15  ;;  %2393 = vmatpush3.bf16.msra.mxu0 %v2457_v19 }
 0xef8   :  { %2406 = vmatprep.subr.bf16.mxu0 %v2534_v15 }
 0xf5a   :  { %v1416_v20 = vpop.f32.mrb[36].mxu0 }
 0xf5b   :  { %v2372_v21 = vpop.f32.mrb[37].mxu0 }
 0xf5c   :  { %v1419_v23 = vpop.f32.mrb[38].mxu0 }
 0xf5d   :  { %v2373_v25 = vpop.f32.mrb[39].mxu0 }
 0xf5e   :  { %v1680_v25 = vrot.slane %v2956_v46, %v790_v8  ;;  %v2462_v8 = vld [vmem:[%s3061_s4 + $0x50] sm:$0xff]  }
 0xfbe   :  { %v1368_v26 = vpop.f32.mrb[36].mxu1 }
 0xfbf   :  { %v1533_v27 = vpack.c.bf16 %v1416_v20, %v1368_v26  ;;  %v2366_v29 = vpop.f32.mrb[37].mxu1 }
 0xfc0   :  { %v1371_v30 = vpop.f32.mrb[38].mxu1 }
 0xfc1   :  { %v2367_v34 = vpop.f32.mrb[39].mxu1  ;;  %2389 = vmatmul.mubr.msk.bf16.vlgmr.msra.gmra.mrb[44].mxu1 %vm186_vm2, %v1533_v27 }
 0xfc2   :  { %2402 = vmatprep.mubr.msk.bf16.mxu1 %vm2535_vm1, %v2534_v15  ;;  %v2461_v34 = vld [vmem:[%s3061_s4 + $0x48] sm:$0xff]  }
 0xfc6   :  { %v1464_v36 = vpop.f32.mrb[40].mxu1 }
 0xfc7   :  { %v2378_v40 = vpop.f32.mrb[41].mxu1 }
 0xfc8   :  { %v1467_v41 = vpop.f32.mrb[42].mxu1  ;;  %v2149_v40 = vld [vmem:[%s3064_s7 + $0x1] ss:$0 sm:$0xff] }
 0xfc9   :  { %v2379_v43 = vpop.f32.mrb[43].mxu1  ;;  %v1512_v45 = vpop.f32.mrb[40].mxu0 }
 0xfca   :  { %v1590_v35 = vpack.c.bf16 %v1512_v45, %v1464_v36  ;;  %v2384_v56 = vpop.f32.mrb[41].mxu0  ;;  %v2463_v36 = vld [vmem:[%s3061_s4 + $0x58] sm:$0xff]  }
 0xfcb   :  { %v1515_v47 = vpop.f32.mrb[42].mxu0 }
 0xfcc   :  { %v2385_v44 = vpop.f32.mrb[43].mxu0  ;;  %2395 = vmatmul.mubr.msk.bf16.vlgmr.msra.gmra.mrb[44].mxu0 %vm186_vm2, %v1590_v35 }
 0xfcd   :  { %2414 = vmatprep.mubr.msk.bf16.mxu0 %vm2535_vm1, %v2534_v15  ;;  %2407 = vmatpush3.bf16.msra.mxu0 %v2460_v4 }
 0xfce   :  { %2408 = vmatprep.subr.bf16.mxu0 %v2534_v15 }
 0xfd1   :  { %2409 = vmatpush3.bf16.msra.mxu0 %v2461_v34  ;;  %v1875_v34 = vrot.slane %v2956_v46, %v984_v22 }
 0xfd2   :  { %2410 = vmatprep.subr.bf16.mxu0 %v2534_v15 }
 0xfd5   :  { %2411 = vmatpush3.bf16.msra.mxu0 %v2462_v8 }
 0xfd6   :  { %2412 = vmatprep.subr.bf16.mxu0 %v2534_v15 }
 0xfd9   :  { %2413 = vmatpush3.bf16.msra.mxu0 %v2463_v36 }
0x1094   :  { %v1577_v63 = vpop.f32.mrb[44].mxu1 }
0x1095   :  { %v2390_v48 = vpop.f32.mrb[45].mxu1  ;;  %v1588_v55 = vadd.f32 %v1587_v54, %v1577_v63 }
0x1096   :  { %v1580_v50 = vpop.f32.mrb[46].mxu1 }
0x1097   :  { %v2391_v52 = vpop.f32.mrb[47].mxu1  ;;  %v1589_v58 = vadd.f32 %v1587_v54, %v1580_v50 }
0x109f   :  { %v1634_v57 = vpop.f32.mrb[44].mxu0 }
0x10a0   :  { %v1641_v59 = vadd.f32 %v1634_v57, %v1588_v55  ;;  %v2396_v49 = vpop.f32.mrb[45].mxu0 }
0x10a1   :  { %v1637_v51 = vpop.f32.mrb[46].mxu0 }
0x10a2   :  { %v1642_v31 = vadd.f32 %v1637_v51, %v1589_v58  ;;  %v2397_v32 = vpop.f32.mrb[47].mxu0  ;;  %v1643_v60 = vadd.f32 %v1641_v59, %v2845_v37 }
0x10a4   :  { %v1645_v61 = vsel %vm52_vm0, %v1643_v60, 0.0  ;;  %v1644_v39 = vadd.f32 %v1642_v31, %v2847_v38  ;;  %v2458_v38 = vld [vmem:[%s3063_s5 + $0x10] sm:$0xff]  }
0x10a5   :  { %1646 = vadd.xlane.f32.xlu0 %v1645_v61  ;;  %2399 = vmatpush3.bf16.msra.mxu1 %v2458_v38 }
0x10a6   :  { %v1648_v62 = vsel %vm52_vm0, %v1644_v39, 0.0  ;;  %2400 = vmatprep.subr.bf16.mxu1 %v2534_v15 }
0x10a7   :  { %1649 = vadd.xlane.f32.xlu1 %v1648_v62 }
0x10a9   :  { %2401 = vmatpush3.bf16.msra.mxu1 %v2459_v9 }
0x10aa   :  { %2418 = vmatprep.subr.bf16.mxu1 %v2534_v15 }
0x1132   :  { %v1647_v42 = vpop.xlane.xlu0 %1646 }
0x1133   :  { %v1651_v33 = vmul.f32 0.03125, %v1647_v42 }
0x1134   :  { %v1650_v0 = vpop.xlane.xlu1 %1649 }
0x1135   :  { %v1653_v1 = vsub.f32 %v1643_v60, %v1651_v33  ;;  %v1652_v2 = vmul.f32 0.03125, %v1650_v0  ;;  %v1775_v33 = vrot.slane %v2956_v46, %v883_v53 }
0x1137   :  { %v1654_v3 = vsub.f32 %v1644_v39, %v1652_v2  ;;  %v1655_v5 = vmul.f32 %v1653_v1, %v1653_v1 }
0x1139   :  { %v1657_v6 = vsel %vm52_vm0, %v1655_v5, 0.0  ;;  %v1656_v7 = vmul.f32 %v1654_v3, %v1654_v3 }
0x113a   :  { %1658 = vadd.xlane.f32.xlu0 %v1657_v6 }
0x113b   :  { %v1660_v37 = vsel %vm52_vm0, %v1656_v7, 0.0 }
0x113e   :  { %1661 = vadd.xlane.f32.xlu0 %v1660_v37 }
0x11c7   :  { %v1659_v10 = vpop.xlane.xlu0 %1658 }
0x11c8   :  { %v1663_v11 = vmul.f32 0.03125, %v1659_v10 }
0x11ca   :  { %v1665_v12 = vadd.f32 1e-12, %v1663_v11 }
0x11cb   :  { %v1662_v13 = vpop.xlane.xlu0 %1661 }
0x11cc   :  { %2518 = vrsqrt.f32 %v1665_v12  ;;  %v1664_v14 = vmul.f32 0.03125, %v1662_v13 }
0x11ce   :  { %v1666_v16 = vadd.f32 1e-12, %v1664_v14 }
0x11d0   :  { %2520 = vrsqrt.f32 %v1666_v16 }
0x11d6   :  { %v2519_v17 = vpop.eup %2518 }
0x11d7   :  { %v1669_v19 = vmul.f32 %v2519_v17, %v1653_v1 }
0x11d9   :  { %v1675_v21 = vmul.f32 %v1674_v18, %v1669_v19 }
0x11da   :  { %v2521_v20 = vpop.eup %2520 }
0x11db   :  { %v1670_v23 = vmul.f32 %v2521_v20, %v1654_v3  ;;  %v1681_v27 = vadd.f32 %v1680_v25, %v1675_v21  ;;  %v2464_v20 = vld [vmem:[%s3065_s10] sm:$0xff]   ;;  %v2465_v21 = vld [vmem:[%s3065_s10 + $0x8] sm:$0xff]  }
0x11dd   :  { %v1676_v26 = vmul.f32 %v1674_v18, %v1670_v23 }
0x11df   :  { %v1682_v29 = vadd.f32 %v1680_v25, %v1676_v26 }
0x11e1   :  { %v1683_v30 = vpack.c.bf16 %v1682_v29, %v1681_v27 }
0x11e3   :  { %2403 = vmatmul.mubr.msk.bf16.vlgmr.msra.gmra.mrb[48].mxu1 %vm52_vm0, %v1683_v30 }
0x11e4   :  { %2422 = vmatprep.mubr.msk.bf16.mxu1 %vm2535_vm1, %v2534_v15  ;;  %2419 = vmatpush3.bf16.msra.mxu1 %v2464_v20 }
0x11e5   :  { %2420 = vmatprep.subr.bf16.mxu1 %v2534_v15 }
0x11e8   :  { %2421 = vmatpush3.bf16.msra.mxu1 %v2465_v21 }
0x11e9   :  { %2426 = vmatprep.subr.bf16.mxu1 %v2534_v15 }
0x12b6   :  { %v1746_v41 = vpop.f32.mrb[48].mxu1 }
0x12b7   :  { %v1747_v43 = vadd.f32 %v2149_v40, %v1746_v41  ;;  %v2404_v45 = vpop.f32.mrb[49].mxu1  ;;  %v1881_v41 = vrot.slane %v2956_v46, %v990_v24  ;;  %v2467_v24 = vld [vmem:[%s3066_s11 + $0x8] sm:$0xff]   ;;  %v2468_v46 = vld [vmem:[%s3066_s11 + $0x10] sm:$0xff]  }
0x12b8   :  { %v1749_v35 = vpop.f32.mrb[50].mxu1 }
0x12b9   :  { %v1755_v56 = vmul.f32 0.044715, %v1747_v43  ;;  %v1750_v47 = vadd.f32 %v2149_v40, %v1749_v35  ;;  %v2405_v44 = vpop.f32.mrb[51].mxu1  ;;  %v1753_v32 = vmul.f32 0.5, %v1747_v43  ;;  %v1884_v35 = vld [vmem:[%s3067_s9] sm:$0x3] }
0x12bb   :  { %v1757_v63 = vmul.f32 %v1755_v56, %v1747_v43  ;;  %v1756_v48 = vmul.f32 0.044715, %v1750_v47  ;;  %v1754_v60 = vmul.f32 0.5, %v1750_v47 }
0x12bd   :  { %v1759_v50 = vmul.f32 %v1757_v63, %v1747_v43  ;;  %v1758_v52 = vmul.f32 %v1756_v48, %v1750_v47 }
0x12bf   :  { %v1761_v54 = vadd.f32 %v1759_v50, %v1747_v43  ;;  %v1760_v55 = vmul.f32 %v1758_v52, %v1750_v47  ;;  %v2469_v52 = vld [vmem:[%s3066_s11 + $0x18] sm:$0xff]   ;;  %s2539_s11 = smov 32  }
0x12c1   :  { %v1763_v57 = vmul.f32 0.7978846, %v1761_v54  ;;  %v1762_v58 = vadd.f32 %v1760_v55, %v1750_v47  ;;  %v1892_v47 = vrot.slane %v1884_v35, 6  ;;  %v2158_v54 = vld [vmem:[%s3068_s12] ss:$0 sm:$0xff] }
0x12c3   :  { %2522 = vtanh.f32 %v1763_v57  ;;  %v1764_v59 = vmul.f32 0.7978846, %v1762_v58 }
0x12c5   :  { %2524 = vtanh.f32 %v1764_v59 }
0x12cd   :  { %v2523_v49 = vpop.eup %2522 }
0x12ce   :  { %v1767_v51 = vadd.f32 1.0, %v2523_v49 }
0x12cf   :  { %v2525_v31 = vpop.eup %2524 }
0x12d0   :  { %v1768_v61 = vadd.f32 1.0, %v2525_v31  ;;  %v1769_v39 = vmul.f32 %v1767_v51, %v1753_v32 }
0x12d2   :  { %v1770_v62 = vmul.f32 %v1768_v61, %v1754_v60 }
0x12d4   :  { %v1771_v42 = vpack.c.bf16 %v1770_v62, %v1769_v39 }
0x12d6   :  { %2415 = vmatmul.mubr.msk.bf16.vlgmr.msra.gmra.mrb[48].mxu0 %vm909_vm5, %v1771_v42 }
0x13a9   :  { %v1837_v0 = vpop.f32.mrb[48].mxu0 }
0x13aa   :  { %v1838_v1 = vadd.f32 %v1837_v0, %v1775_v33  ;;  %v2416_v2 = vpop.f32.mrb[49].mxu0 }
0x13ab   :  { %v1840_v3 = vpop.f32.mrb[50].mxu0 }
0x13ac   :  { %v1841_v5 = vadd.f32 %v1840_v3, %v1775_v33  ;;  %v2417_v6 = vpop.f32.mrb[51].mxu0  ;;  %v1844_v7 = vadd.f32 %v1838_v1, %v1681_v27 }
0x13ae   :  { %v1846_v37 = vsel %vm52_vm0, %v1844_v7, 0.0  ;;  %v1845_v38 = vadd.f32 %v1841_v5, %v1682_v29 }
0x13af   :  { %1847 = vadd.xlane.f32.xlu1 %v1846_v37 }
0x13b0   :  { %v1849_v9 = vsel %vm52_vm0, %v1845_v38, 0.0 }
0x13b1   :  { %1850 = vadd.xlane.f32.xlu0 %v1849_v9 }
0x143c   :  { %v1848_v10 = vpop.xlane.xlu1 %1847 }
0x143d   :  { %v1852_v11 = vmul.f32 0.03125, %v1848_v10 }
0x143e   :  { %v1851_v12 = vpop.xlane.xlu0 %1850 }
0x143f   :  { %v1854_v13 = vsub.f32 %v1844_v7, %v1852_v11  ;;  %v1853_v14 = vmul.f32 0.03125, %v1851_v12 }
0x1441   :  { %v1855_v53 = vsub.f32 %v1845_v38, %v1853_v14  ;;  %v1856_v16 = vmul.f32 %v1854_v13, %v1854_v13 }
0x1443   :  { %v1858_v17 = vsel %vm52_vm0, %v1856_v16, 0.0  ;;  %v1857_v18 = vmul.f32 %v1855_v53, %v1855_v53 }
0x1444   :  { %1859 = vadd.xlane.f32.xlu1 %v1858_v17 }
0x1445   :  { %v1861_v19 = vsel %vm52_vm0, %v1857_v18, 0.0 }
0x1446   :  { %1862 = vadd.xlane.f32.xlu0 %v1861_v19 }
0x14d1   :  { %v1860_v23 = vpop.xlane.xlu1 %1859 }
0x14d2   :  { %v1864_v25 = vmul.f32 0.03125, %v1860_v23 }
0x14d3   :  { %v1863_v26 = vpop.xlane.xlu0 %1862 }
0x14d4   :  { %v1866_v27 = vadd.f32 1e-12, %v1864_v25  ;;  %v1865_v29 = vmul.f32 0.03125, %v1863_v26 }
0x14d6   :  { %2526 = vrsqrt.f32 %v1866_v27  ;;  %v1867_v30 = vadd.f32 1e-12, %v1865_v29 }
0x14d8   :  { %2528 = vrsqrt.f32 %v1867_v30 }
0x14e0   :  { %v2527_v4 = vpop.eup %2526 }
0x14e1   :  { %v1870_v8 = vmul.f32 %v2527_v4, %v1854_v13 }
0x14e2   :  { %v2529_v36 = vpop.eup %2528 }
0x14e3   :  { %v1871_v40 = vmul.f32 %v2529_v36, %v1855_v53  ;;  %v1876_v43 = vmul.f32 %v1875_v34, %v1870_v8 }
0x14e5   :  { %v1877_v45 = vmul.f32 %v1875_v34, %v1871_v40  ;;  %v1882_v44 = vadd.f32 %v1881_v41, %v1876_v43 }
0x14e7   :  { %v1883_v56 = vadd.f32 %v1881_v41, %v1877_v45 }
0x14e9   :  { %v1887_v63 = vrot.slane %v1883_v56, 7 }
0x14eb   :  { %v1889_v22 = vsel %vm1888_vm6, %v1887_v63, %v1882_v44 }
0x14ec   :  { %v1895_v48 = vsel %vm1894_vm7, %v1889_v22, %v1892_v47 }
0x14ed   :  { %v1896_v50 = vpack.c.bf16 %v1895_v48, %v1895_v48 }
0x14ef   :  { %2423 = vmatmul.mubr.msk.bf16.vlgmr.msra.gmra.mrb[52].mxu1 %vm52_vm0, %v1896_v50 }
0x14f0   :  { %2427 = vmatpush3.bf16.msra.mxu1 %v2466_v28  ;;  %2434 = vmatprep.mubr.msk.bf16.mxu1 %vm2535_vm1, %v2534_v15 }
0x14f1   :  { %2428 = vmatprep.subr.bf16.mxu1 %v2534_v15 }
0x14f4   :  { %2429 = vmatpush3.bf16.msra.mxu1 %v2467_v24 }
0x14f5   :  { %2430 = vmatprep.subr.bf16.mxu1 %v2534_v15 }
0x14f8   :  { %2431 = vmatpush3.bf16.msra.mxu1 %v2468_v46 }
0x14f9   :  { %2432 = vmatprep.subr.bf16.mxu1 %v2534_v15  ;;  %v2162_v15 = vld [vmem:[%s3069_s13] ss:$0 sm:$0xff] }
0x14fc   :  { %2433 = vmatpush3.bf16.msra.mxu1 %v2469_v52 }
0x15c2   :  { %v1957_v55 = vpop.f32.mrb[52].mxu1 }
0x15c3   :  { %v1958_v57 = vadd.f32 %v2158_v54, %v1957_v55  ;;  %v2424_v58 = vpop.f32.mrb[53].mxu1 }
0x15c4   :  { %v1960_v59 = vpop.f32.mrb[54].mxu1 }
0x15c5   :  { %vm1963_vm8 = vcmp.gt.f32.partialorder %v1958_v57, 0.0  ;;  %v1964_v49 = vmul.f32 0.01, %v1958_v57  ;;  %v2425_v51 = vpop.f32.mrb[55].mxu1 }
0x15c7   :  { %v1965_v31 = vsel %vm1963_vm8, %v1958_v57, %v1964_v49 }
0x15c8   :  { %v1966_v32 = vpack.c.bf16 %v1965_v31, %v1965_v31 }
0x15ca   :  { %2435 = vmatmul.mubr.msk.bf16.vlgmr.msra.gmra.mrb[56].mxu1 %vm909_vm5, %v1966_v32 }
0x169d   :  { %v2043_v60 = vpop.f32.mrb[56].mxu1 }
0x169e   :  { %v2044_v61 = vadd.f32 %v2162_v15, %v2043_v60  ;;  %v2436_v39 = vpop.f32.mrb[57].mxu1 }
0x169f   :  { %v2046_v62 = vpop.f32.mrb[58].mxu1 }
0x16a0   :  { %v2437_v42 = vpop.f32.mrb[59].mxu1  ;;  %v2050_v33 = vsel %vm2049_vm9, %v2044_v61, -inf }
0x16a1   :  { %2051 = vmax.xlane.f32.xlu0 %v2050_v33 }
0x172e   :  { %v2052_v0 = vpop.xlane.xlu0 %2051 }
0x172f   :  { %v2053_v1 = vsub.f32 %v2044_v61, %v2052_v0 }
0x1731   :  { %v2054_v2 = vmul.f32 1.442695, %v2053_v1 }
0x1733   :  { %2530 = vpow2.f32 %v2054_v2 }
0x173d   :  { %v2531_v3 = vpop.eup %2530 }
0x173e   :  { %v2056_v5 = vsel %vm2049_vm9, %v2531_v3, 0.0 }
0x173f   :  { %2057 = vadd.xlane.f32.xlu1 %v2056_v5 }
0x17cc   :  { %v2058_v6 = vpop.xlane.xlu1 %2057 }
0x17cd   :  { %2532 = vrcp.f32 %v2058_v6 }
0x17d7   :  { %v2533_v7 = vpop.eup %2532 }
0x17d8   :  { %v2060_v37 = vmul.f32 %v2533_v7, %v2531_v3 }
0x17da   :  { %2062 = vrot.lane.b32.xlu0 %v2060_v37, %s2539_s11 }
0x184c   :  { %v2063_v38 = vpop.permute.xlu0 %2062 }
0x184d   :  { %v2065_v9 = vsel %vm52_vm0, %v1895_v48, %v2063_v38 }
0x184e   :  { %v2067_v10 = vsel %vm2066_vm10, %v2065_v9, 0.0 }
0x184f   :  { %2068 = vst [vmem:[%s3070_s14] sm:$0xf] %v2067_v10 }

</bundles_post_ra>
